<compile_context>
chip_gen: v5e
topology: v5e:2x2
jax: 0.10.0
libtpu: 0.0.40
codegen_flags: <defaults>
</compile_context>

<pallas_src>
import functools

import jax
import jax.numpy as jnp
from jax import lax
from jax.experimental import pallas as pl
from jax.experimental.pallas import tpu as pltpu


def _decoder_kernel(num_layers, hidden_size, num_steps, precision,
                    x_ref, h_ref, c_ref,
                    w_ref, b_ref, gscale_ref, goff_ref,
                    wlin_ref, blin_ref,
                    out_ref):
    """One invocation runs all (step_size + 3) LSTM steps + the linear head."""
    H = hidden_size

    # Hoist loop-invariant loads (num_layers is small and static). Pins ~16 vregs for the
    # f32 weights; if a bundle dump ever shows spill *stores*, stage these as bf16 instead.
    w = [w_ref[l] for l in range(num_layers)]   # (2H, 4H); i/f/o columns pre-scaled by 0.5
    b = [b_ref[l] for l in range(num_layers)]   # (B, 4H);  pre-broadcast, full-vreg add
    gate_scale = gscale_ref[...]                # (B, 4H): 0.5 on i/f/o lanes, 1.0 on g lanes
    gate_off = goff_ref[...]                    # (B, 4H): 0.5 on i/f/o lanes, 0.0 on g lanes

    # Initial state -> values (vregs), carried through the loop; no VMEM scratch.
    x0 = x_ref[...].astype(jnp.float32)
    h0 = tuple(h_ref[l].astype(jnp.float32) for l in range(num_layers))
    c0 = tuple(c_ref[l].astype(jnp.float32) for l in range(num_layers))

    def timestep(_, carry):
        x, hs, cs = carry
        hs = list(hs)
        cs = list(cs)
        for l in range(num_layers):                       # layers unrolled (static)
            xh = jnp.concatenate([x, hs[l]], axis=-1)     # (B, 2H), single-vreg lane concat
            # Fused matmul; i/f/o columns of w/b are pre-halved, so those lanes hold z/2.
            z_half = jnp.dot(xh, w[l],
                             preferred_element_type=jnp.float32,
                             precision=precision) + b[l]
            t = jnp.tanh(z_half)                          # ONE EUP pass on the full vreg
            # i/f/o lanes: sigmoid(z) = 0.5*(1 + tanh(z/2));  g lanes: tanh(z) = t.
            act = t * gate_scale + gate_off               # per-lane affine, no select
            i_g = act[:, 0 * H:1 * H]
            f_g = act[:, 1 * H:2 * H]
            g_g = act[:, 2 * H:3 * H]
            o_g = act[:, 3 * H:4 * H]
            c_new = f_g * cs[l] + i_g * g_g
            h_new = o_g * jnp.tanh(c_new)
            cs[l] = c_new
            hs[l] = h_new
            x = h_new                                     # feed into next layer
        return x, tuple(hs), tuple(cs)

    # Fully unrolled: lets the scheduler overlap step i's VPU/EUP work with step i+1's
    # MXU pushes; state stays in registers across the whole chain.
    x_final, _, _ = lax.fori_loop(0, num_steps, timestep, (x0, h0, c0), unroll=True)

    pred = jnp.dot(x_final, wlin_ref[...],
                   preferred_element_type=jnp.float32,
                   precision=precision) + blin_ref[...]
    out_ref[...] = pred.astype(out_ref.dtype)


def decoder_forward(x, h0, c0, params, *, num_layers, hidden_size, output_size, step_size,
                    precision=lax.Precision.DEFAULT):
    """x: (B, input_size) with input_size == hidden_size; h0/c0: (L, B, H)."""
    W_ih, W_hh, b_ih, b_hh, W_lin, b_lin = params
    B, input_size = x.shape
    assert input_size == hidden_size, (
        "Decoder feeds the LSTM output back as its own input; requires input_size == hidden_size")
    H = hidden_size
    O = output_size
    num_steps = step_size + 3

    # --- Glue: fuse & pre-scale weights so the kernel does one matmul + one tanh per layer-step.
    wih_t = jnp.transpose(W_ih, (0, 2, 1))                  # (L, H, 4H)
    whh_t = jnp.transpose(W_hh, (0, 2, 1))                  # (L, H, 4H)
    w_fused = jnp.concatenate([wih_t, whh_t], axis=1)       # (L, 2H, 4H): [x|h] @ W_fused
    bias = (b_ih + b_hh)[:, None, :]                        # (L, 1, 4H)

    # sigmoid(z) = 0.5*(1 + tanh(z/2)): halve the i/f/o gate columns, keep g (tanh) at 1.
    col = jnp.arange(4 * H)
    is_g = (col >= 2 * H) & (col < 3 * H)
    col_scale = jnp.where(is_g, 1.0, 0.5).astype(jnp.float32)
    w_fused = w_fused * col_scale
    bias = bias * col_scale

    # Pre-broadcast so every in-loop add/mul is a plain full-vreg op (no in-kernel broadcast).
    bias_b = jnp.broadcast_to(bias, (num_layers, B, 4 * H)).astype(jnp.float32)
    gate_scale = jnp.broadcast_to(jnp.where(is_g, 1.0, 0.5).astype(jnp.float32)[None, :],
                                  (B, 4 * H))
    gate_off = jnp.broadcast_to(jnp.where(is_g, 0.0, 0.5).astype(jnp.float32)[None, :],
                                (B, 4 * H))

    wlin_t = W_lin.T                                        # (H, O)
    blin = jnp.broadcast_to(b_lin[None, :], (B, O)).astype(jnp.float32)

    cost = pl.CostEstimate(
        flops=num_steps * num_layers * 2 * B * (2 * H) * (4 * H) + 2 * B * H * O,
        transcendentals=num_steps * num_layers * B * 5 * H,
        bytes_accessed=4 * (x.size + h0.size + c0.size + w_fused.size + bias_b.size
                            + gate_scale.size + gate_off.size + wlin_t.size + blin.size
                            + B * O),
    )

    kernel = functools.partial(_decoder_kernel, num_layers, hidden_size, num_steps, precision)
    vmem_spec = pl.BlockSpec(memory_space=pltpu.MemorySpace.VMEM)

    # No grid: B=8 fits one TensorCore.  If B grows (or on v7x with concurrent sequences),
    # add a leading batch grid axis with dimension_semantics=("parallel",).
    return pl.pallas_call(
        kernel,
        out_shape=jax.ShapeDtypeStruct((B, O), jnp.float32),
        in_specs=[vmem_spec] * 9,
        out_specs=vmem_spec,
        cost_estimate=cost,
    )(x, h0, c0, w_fused, bias_b, gate_scale, gate_off, wlin_t, blin)


def reference_forward(x, h0, c0, params, *, step_size):
    """Pure-JAX mirror of the PyTorch forward, using the original weight layout."""
    W_ih, W_hh, b_ih, b_hh, W_lin, b_lin = params
    H = h0.shape[-1]
    L = h0.shape[0]
    h = h0
    c = c0
    for _ in range(step_size + 3):
        xs = x
        hs, cs = [], []
        for l in range(L):
            gates = xs @ W_ih[l].T + b_ih[l] + h[l] @ W_hh[l].T + b_hh[l]
            i_g = jax.nn.sigmoid(gates[:, 0 * H:1 * H])
            f_g = jax.nn.sigmoid(gates[:, 1 * H:2 * H])
            g_g = jnp.tanh(gates[:, 2 * H:3 * H])
            o_g = jax.nn.sigmoid(gates[:, 3 * H:4 * H])
            cn = f_g * c[l] + i_g * g_g
            hn = o_g * jnp.tanh(cn)
            hs.append(hn)
            cs.append(cn)
            xs = hn
        h = jnp.stack(hs)
        c = jnp.stack(cs)
        x = xs
    return x @ W_lin.T + b_lin


if __name__ == "__main__":
    # Module config (input_size must equal hidden_size for the forward to be valid).
    input_size = 32
    hidden_size = 32
    num_layers = 2
    output_size = 16
    batch_size = 8
    step_size = 5      # kernel runs step_size + 3 = 8 LSTM steps

    key = jax.random.PRNGKey(0)
    ks = jax.random.split(key, 9)
    bound = 1.0 / jnp.sqrt(hidden_size)

    # PyTorch-style uniform(-1/sqrt(H), 1/sqrt(H)) init, deterministic.
    W_ih = jax.random.uniform(ks[0], (num_layers, 4 * hidden_size, input_size),
                              minval=-bound, maxval=bound, dtype=jnp.float32)
    W_hh = jax.random.uniform(ks[1], (num_layers, 4 * hidden_size, hidden_size),
                              minval=-bound, maxval=bound, dtype=jnp.float32)
    b_ih = jax.random.uniform(ks[2], (num_layers, 4 * hidden_size),
                              minval=-bound, maxval=bound, dtype=jnp.float32)
    b_hh = jax.random.uniform(ks[3], (num_layers, 4 * hidden_size),
                              minval=-bound, maxval=bound, dtype=jnp.float32)
    W_lin = jax.random.uniform(ks[4], (output_size, hidden_size),
                               minval=-bound, maxval=bound, dtype=jnp.float32)
    b_lin = jax.random.uniform(ks[5], (output_size,),
                               minval=-bound, maxval=bound, dtype=jnp.float32)
    params = (W_ih, W_hh, b_ih, b_hh, W_lin, b_lin)

    # Inputs: input_seq (B, input_size) -> viewed as (B, 1, input_size) in PyTorch;
    # h, c: (num_layers, B, hidden_size).
    x = jax.random.normal(ks[6], (batch_size, input_size), dtype=jnp.float32)
    h0 = jax.random.normal(ks[7], (num_layers, batch_size, hidden_size), dtype=jnp.float32)
    c0 = jax.random.normal(ks[8], (num_layers, batch_size, hidden_size), dtype=jnp.float32)

    pred = decoder_forward(x, h0, c0, params,
                           num_layers=num_layers, hidden_size=hidden_size,
                           output_size=output_size, step_size=step_size)
    pred = jax.block_until_ready(pred)

    ref = reference_forward(x, h0, c0, params, step_size=step_size)
    assert pred.shape == (batch_size, output_size)
    # Tolerance 5e-2: the kernel deliberately uses single-pass MXU precision
    # (lax.Precision.DEFAULT, bf16 operands / f32 accumulate) over a 16-deep recurrent
    # chain, and the fused-K / pre-halved-column matmul rounds differently from the
    # reference's split matmuls.  Bounded-gate error analysis puts the worst-case
    # divergence at ~2e-2 on outputs of magnitude ~0.5; use precision=HIGHEST for 1e-4.
    assert jnp.allclose(pred, ref, rtol=5e-2, atol=5e-2), (
        f"max abs err = {jnp.max(jnp.abs(pred - ref))}")

    print("KERNEL_OK")
</pallas_src>

<mosaic_0001>
module attributes {stable_mosaic.version = 11 : i64} {
  func.func @_decoder_kernel(%arg0: memref<8x32xf32, #tpu.memory_space<vmem>>, %arg1: memref<2x8x32xf32, #tpu.memory_space<vmem>>, %arg2: memref<2x8x32xf32, #tpu.memory_space<vmem>>, %arg3: memref<2x64x128xf32, #tpu.memory_space<vmem>>, %arg4: memref<2x8x128xf32, #tpu.memory_space<vmem>>, %arg5: memref<8x128xf32, #tpu.memory_space<vmem>>, %arg6: memref<8x128xf32, #tpu.memory_space<vmem>>, %arg7: memref<32x16xf32, #tpu.memory_space<vmem>>, %arg8: memref<8x16xf32, #tpu.memory_space<vmem>>, %arg9: memref<8x16xf32, #tpu.memory_space<vmem>>) attributes {dimension_semantics = [], scalar_prefetch = 0 : i64, scratch_operands = 0 : i64, tpu.core_type = #tpu.core_type<tc>} {
    %c0 = arith.constant 0 : index
    %c0_0 = arith.constant 0 : index
    %c0_1 = arith.constant 0 : index
    %0 = vector.load %arg3[%c0, %c0_0, %c0_1] : memref<2x64x128xf32, #tpu.memory_space<vmem>>, vector<1x64x128xf32>
    %1 = vector.shape_cast %0 : vector<1x64x128xf32> to vector<64x128xf32>
    %c1 = arith.constant 1 : index
    %c0_2 = arith.constant 0 : index
    %c0_3 = arith.constant 0 : index
    %2 = vector.load %arg3[%c1, %c0_2, %c0_3] : memref<2x64x128xf32, #tpu.memory_space<vmem>>, vector<1x64x128xf32>
    %3 = vector.shape_cast %2 : vector<1x64x128xf32> to vector<64x128xf32>
    %c0_4 = arith.constant 0 : index
    %c0_5 = arith.constant 0 : index
    %c0_6 = arith.constant 0 : index
    %4 = vector.load %arg4[%c0_4, %c0_5, %c0_6] : memref<2x8x128xf32, #tpu.memory_space<vmem>>, vector<1x8x128xf32>
    %5 = vector.shape_cast %4 : vector<1x8x128xf32> to vector<8x128xf32>
    %c1_7 = arith.constant 1 : index
    %c0_8 = arith.constant 0 : index
    %c0_9 = arith.constant 0 : index
    %6 = vector.load %arg4[%c1_7, %c0_8, %c0_9] : memref<2x8x128xf32, #tpu.memory_space<vmem>>, vector<1x8x128xf32>
    %7 = vector.shape_cast %6 : vector<1x8x128xf32> to vector<8x128xf32>
    %c0_10 = arith.constant 0 : index
    %c0_11 = arith.constant 0 : index
    %8 = vector.load %arg5[%c0_10, %c0_11] : memref<8x128xf32, #tpu.memory_space<vmem>>, vector<8x128xf32>
    %c0_12 = arith.constant 0 : index
    %c0_13 = arith.constant 0 : index
    %9 = vector.load %arg6[%c0_12, %c0_13] : memref<8x128xf32, #tpu.memory_space<vmem>>, vector<8x128xf32>
    %c0_14 = arith.constant 0 : index
    %c0_15 = arith.constant 0 : index
    %10 = vector.load %arg0[%c0_14, %c0_15] : memref<8x32xf32, #tpu.memory_space<vmem>>, vector<8x32xf32>
    %c0_16 = arith.constant 0 : index
    %c0_17 = arith.constant 0 : index
    %c0_18 = arith.constant 0 : index
    %11 = vector.load %arg1[%c0_16, %c0_17, %c0_18] : memref<2x8x32xf32, #tpu.memory_space<vmem>>, vector<1x8x32xf32>
    %12 = vector.shape_cast %11 : vector<1x8x32xf32> to vector<8x32xf32>
    %c1_19 = arith.constant 1 : index
    %c0_20 = arith.constant 0 : index
    %c0_21 = arith.constant 0 : index
    %13 = vector.load %arg1[%c1_19, %c0_20, %c0_21] : memref<2x8x32xf32, #tpu.memory_space<vmem>>, vector<1x8x32xf32>
    %14 = vector.shape_cast %13 : vector<1x8x32xf32> to vector<8x32xf32>
    %c0_22 = arith.constant 0 : index
    %c0_23 = arith.constant 0 : index
    %c0_24 = arith.constant 0 : index
    %15 = vector.load %arg2[%c0_22, %c0_23, %c0_24] : memref<2x8x32xf32, #tpu.memory_space<vmem>>, vector<1x8x32xf32>
    %16 = vector.shape_cast %15 : vector<1x8x32xf32> to vector<8x32xf32>
    %c1_25 = arith.constant 1 : index
    %c0_26 = arith.constant 0 : index
    %c0_27 = arith.constant 0 : index
    %17 = vector.load %arg2[%c1_25, %c0_26, %c0_27] : memref<2x8x32xf32, #tpu.memory_space<vmem>>, vector<1x8x32xf32>
    %18 = vector.shape_cast %17 : vector<1x8x32xf32> to vector<8x32xf32>
    %c0_i32 = arith.constant 0 : i32
    %19 = tpu.concatenate %10, %12 in 1 : vector<8x32xf32>, vector<8x32xf32> -> vector<8x64xf32>
    %cst = arith.constant dense<0.000000e+00> : vector<8x128xf32>
    %20 = tpu.matmul %19, %1, %cst {dimension_numbers = #tpu.dot_dimension_numbers<[1], [0], [0], [1], [0, 0, 1, 1], [], []>} : vector<8x64xf32>, vector<64x128xf32>, vector<8x128xf32> -> vector<8x128xf32>
    %21 = arith.addf %20, %5 : vector<8x128xf32>
    %22 = math.tanh %21 : vector<8x128xf32>
    %23 = arith.mulf %22, %8 : vector<8x128xf32>
    %24 = arith.addf %23, %9 : vector<8x128xf32>
    %25 = vector.extract_strided_slice %24 {offsets = [0, 0], sizes = [8, 32], strides = [1, 1]} : vector<8x128xf32> to vector<8x32xf32>
    %26 = vector.extract_strided_slice %24 {offsets = [0, 32], sizes = [8, 32], strides = [1, 1]} : vector<8x128xf32> to vector<8x32xf32>
    %27 = vector.extract_strided_slice %24 {offsets = [0, 64], sizes = [8, 32], strides = [1, 1]} : vector<8x128xf32> to vector<8x32xf32>
    %28 = vector.extract_strided_slice %24 {offsets = [0, 96], sizes = [8, 32], strides = [1, 1]} : vector<8x128xf32> to vector<8x32xf32>
    %29 = arith.mulf %26, %16 : vector<8x32xf32>
    %30 = arith.mulf %25, %27 : vector<8x32xf32>
    %31 = arith.addf %29, %30 : vector<8x32xf32>
    %32 = math.tanh %31 : vector<8x32xf32>
    %33 = arith.mulf %28, %32 : vector<8x32xf32>
    %34 = tpu.concatenate %33, %14 in 1 : vector<8x32xf32>, vector<8x32xf32> -> vector<8x64xf32>
    %cst_28 = arith.constant dense<0.000000e+00> : vector<8x128xf32>
    %35 = tpu.matmul %34, %3, %cst_28 {dimension_numbers = #tpu.dot_dimension_numbers<[1], [0], [0], [1], [0, 0, 1, 1], [], []>} : vector<8x64xf32>, vector<64x128xf32>, vector<8x128xf32> -> vector<8x128xf32>
    %36 = arith.addf %35, %7 : vector<8x128xf32>
    %37 = math.tanh %36 : vector<8x128xf32>
    %38 = arith.mulf %37, %8 : vector<8x128xf32>
    %39 = arith.addf %38, %9 : vector<8x128xf32>
    %40 = vector.extract_strided_slice %39 {offsets = [0, 0], sizes = [8, 32], strides = [1, 1]} : vector<8x128xf32> to vector<8x32xf32>
    %41 = vector.extract_strided_slice %39 {offsets = [0, 32], sizes = [8, 32], strides = [1, 1]} : vector<8x128xf32> to vector<8x32xf32>
    %42 = vector.extract_strided_slice %39 {offsets = [0, 64], sizes = [8, 32], strides = [1, 1]} : vector<8x128xf32> to vector<8x32xf32>
    %43 = vector.extract_strided_slice %39 {offsets = [0, 96], sizes = [8, 32], strides = [1, 1]} : vector<8x128xf32> to vector<8x32xf32>
    %44 = arith.mulf %41, %18 : vector<8x32xf32>
    %45 = arith.mulf %40, %42 : vector<8x32xf32>
    %46 = arith.addf %44, %45 : vector<8x32xf32>
    %47 = math.tanh %46 : vector<8x32xf32>
    %48 = arith.mulf %43, %47 : vector<8x32xf32>
    %c1_i32 = arith.constant 1 : i32
    %49 = tpu.concatenate %48, %33 in 1 : vector<8x32xf32>, vector<8x32xf32> -> vector<8x64xf32>
    %cst_29 = arith.constant dense<0.000000e+00> : vector<8x128xf32>
    %50 = tpu.matmul %49, %1, %cst_29 {dimension_numbers = #tpu.dot_dimension_numbers<[1], [0], [0], [1], [0, 0, 1, 1], [], []>} : vector<8x64xf32>, vector<64x128xf32>, vector<8x128xf32> -> vector<8x128xf32>
    %51 = arith.addf %50, %5 : vector<8x128xf32>
    %52 = math.tanh %51 : vector<8x128xf32>
    %53 = arith.mulf %52, %8 : vector<8x128xf32>
    %54 = arith.addf %53, %9 : vector<8x128xf32>
    %55 = vector.extract_strided_slice %54 {offsets = [0, 0], sizes = [8, 32], strides = [1, 1]} : vector<8x128xf32> to vector<8x32xf32>
    %56 = vector.extract_strided_slice %54 {offsets = [0, 32], sizes = [8, 32], strides = [1, 1]} : vector<8x128xf32> to vector<8x32xf32>
    %57 = vector.extract_strided_slice %54 {offsets = [0, 64], sizes = [8, 32], strides = [1, 1]} : vector<8x128xf32> to vector<8x32xf32>
    %58 = vector.extract_strided_slice %54 {offsets = [0, 96], sizes = [8, 32], strides = [1, 1]} : vector<8x128xf32> to vector<8x32xf32>
    %59 = arith.mulf %56, %31 : vector<8x32xf32>
    %60 = arith.mulf %55, %57 : vector<8x32xf32>
    %61 = arith.addf %59, %60 : vector<8x32xf32>
    %62 = math.tanh %61 : vector<8x32xf32>
    %63 = arith.mulf %58, %62 : vector<8x32xf32>
    %64 = tpu.concatenate %63, %48 in 1 : vector<8x32xf32>, vector<8x32xf32> -> vector<8x64xf32>
    %cst_30 = arith.constant dense<0.000000e+00> : vector<8x128xf32>
    %65 = tpu.matmul %64, %3, %cst_30 {dimension_numbers = #tpu.dot_dimension_numbers<[1], [0], [0], [1], [0, 0, 1, 1], [], []>} : vector<8x64xf32>, vector<64x128xf32>, vector<8x128xf32> -> vector<8x128xf32>
    %66 = arith.addf %65, %7 : vector<8x128xf32>
    %67 = math.tanh %66 : vector<8x128xf32>
    %68 = arith.mulf %67, %8 : vector<8x128xf32>
    %69 = arith.addf %68, %9 : vector<8x128xf32>
    %70 = vector.extract_strided_slice %69 {offsets = [0, 0], sizes = [8, 32], strides = [1, 1]} : vector<8x128xf32> to vector<8x32xf32>
    %71 = vector.extract_strided_slice %69 {offsets = [0, 32], sizes = [8, 32], strides = [1, 1]} : vector<8x128xf32> to vector<8x32xf32>
    %72 = vector.extract_strided_slice %69 {offsets = [0, 64], sizes = [8, 32], strides = [1, 1]} : vector<8x128xf32> to vector<8x32xf32>
    %73 = vector.extract_strided_slice %69 {offsets = [0, 96], sizes = [8, 32], strides = [1, 1]} : vector<8x128xf32> to vector<8x32xf32>
    %74 = arith.mulf %71, %46 : vector<8x32xf32>
    %75 = arith.mulf %70, %72 : vector<8x32xf32>
    %76 = arith.addf %74, %75 : vector<8x32xf32>
    %77 = math.tanh %76 : vector<8x32xf32>
    %78 = arith.mulf %73, %77 : vector<8x32xf32>
    %c2_i32 = arith.constant 2 : i32
    %79 = tpu.concatenate %78, %63 in 1 : vector<8x32xf32>, vector<8x32xf32> -> vector<8x64xf32>
    %cst_31 = arith.constant dense<0.000000e+00> : vector<8x128xf32>
    %80 = tpu.matmul %79, %1, %cst_31 {dimension_numbers = #tpu.dot_dimension_numbers<[1], [0], [0], [1], [0, 0, 1, 1], [], []>} : vector<8x64xf32>, vector<64x128xf32>, vector<8x128xf32> -> vector<8x128xf32>
    %81 = arith.addf %80, %5 : vector<8x128xf32>
    %82 = math.tanh %81 : vector<8x128xf32>
    %83 = arith.mulf %82, %8 : vector<8x128xf32>
    %84 = arith.addf %83, %9 : vector<8x128xf32>
    %85 = vector.extract_strided_slice %84 {offsets = [0, 0], sizes = [8, 32], strides = [1, 1]} : vector<8x128xf32> to vector<8x32xf32>
    %86 = vector.extract_strided_slice %84 {offsets = [0, 32], sizes = [8, 32], strides = [1, 1]} : vector<8x128xf32> to vector<8x32xf32>
    %87 = vector.extract_strided_slice %84 {offsets = [0, 64], sizes = [8, 32], strides = [1, 1]} : vector<8x128xf32> to vector<8x32xf32>
    %88 = vector.extract_strided_slice %84 {offsets = [0, 96], sizes = [8, 32], strides = [1, 1]} : vector<8x128xf32> to vector<8x32xf32>
    %89 = arith.mulf %86, %61 : vector<8x32xf32>
    %90 = arith.mulf %85, %87 : vector<8x32xf32>
    %91 = arith.addf %89, %90 : vector<8x32xf32>
    %92 = math.tanh %91 : vector<8x32xf32>
    %93 = arith.mulf %88, %92 : vector<8x32xf32>
    %94 = tpu.concatenate %93, %78 in 1 : vector<8x32xf32>, vector<8x32xf32> -> vector<8x64xf32>
    %cst_32 = arith.constant dense<0.000000e+00> : vector<8x128xf32>
    %95 = tpu.matmul %94, %3, %cst_32 {dimension_numbers = #tpu.dot_dimension_numbers<[1], [0], [0], [1], [0, 0, 1, 1], [], []>} : vector<8x64xf32>, vector<64x128xf32>, vector<8x128xf32> -> vector<8x128xf32>
    %96 = arith.addf %95, %7 : vector<8x128xf32>
    %97 = math.tanh %96 : vector<8x128xf32>
    %98 = arith.mulf %97, %8 : vector<8x128xf32>
    %99 = arith.addf %98, %9 : vector<8x128xf32>
    %100 = vector.extract_strided_slice %99 {offsets = [0, 0], sizes = [8, 32], strides = [1, 1]} : vector<8x128xf32> to vector<8x32xf32>
    %101 = vector.extract_strided_slice %99 {offsets = [0, 32], sizes = [8, 32], strides = [1, 1]} : vector<8x128xf32> to vector<8x32xf32>
    %102 = vector.extract_strided_slice %99 {offsets = [0, 64], sizes = [8, 32], strides = [1, 1]} : vector<8x128xf32> to vector<8x32xf32>
    %103 = vector.extract_strided_slice %99 {offsets = [0, 96], sizes = [8, 32], strides = [1, 1]} : vector<8x128xf32> to vector<8x32xf32>
    %104 = arith.mulf %101, %76 : vector<8x32xf32>
    %105 = arith.mulf %100, %102 : vector<8x32xf32>
    %106 = arith.addf %104, %105 : vector<8x32xf32>
    %107 = math.tanh %106 : vector<8x32xf32>
    %108 = arith.mulf %103, %107 : vector<8x32xf32>
    %c3_i32 = arith.constant 3 : i32
    %109 = tpu.concatenate %108, %93 in 1 : vector<8x32xf32>, vector<8x32xf32> -> vector<8x64xf32>
    %cst_33 = arith.constant dense<0.000000e+00> : vector<8x128xf32>
    %110 = tpu.matmul %109, %1, %cst_33 {dimension_numbers = #tpu.dot_dimension_numbers<[1], [0], [0], [1], [0, 0, 1, 1], [], []>} : vector<8x64xf32>, vector<64x128xf32>, vector<8x128xf32> -> vector<8x128xf32>
    %111 = arith.addf %110, %5 : vector<8x128xf32>
    %112 = math.tanh %111 : vector<8x128xf32>
    %113 = arith.mulf %112, %8 : vector<8x128xf32>
    %114 = arith.addf %113, %9 : vector<8x128xf32>
    %115 = vector.extract_strided_slice %114 {offsets = [0, 0], sizes = [8, 32], strides = [1, 1]} : vector<8x128xf32> to vector<8x32xf32>
    %116 = vector.extract_strided_slice %114 {offsets = [0, 32], sizes = [8, 32], strides = [1, 1]} : vector<8x128xf32> to vector<8x32xf32>
    %117 = vector.extract_strided_slice %114 {offsets = [0, 64], sizes = [8, 32], strides = [1, 1]} : vector<8x128xf32> to vector<8x32xf32>
    %118 = vector.extract_strided_slice %114 {offsets = [0, 96], sizes = [8, 32], strides = [1, 1]} : vector<8x128xf32> to vector<8x32xf32>
    %119 = arith.mulf %116, %91 : vector<8x32xf32>
    %120 = arith.mulf %115, %117 : vector<8x32xf32>
    %121 = arith.addf %119, %120 : vector<8x32xf32>
    %122 = math.tanh %121 : vector<8x32xf32>
    %123 = arith.mulf %118, %122 : vector<8x32xf32>
    %124 = tpu.concatenate %123, %108 in 1 : vector<8x32xf32>, vector<8x32xf32> -> vector<8x64xf32>
    %cst_34 = arith.constant dense<0.000000e+00> : vector<8x128xf32>
    %125 = tpu.matmul %124, %3, %cst_34 {dimension_numbers = #tpu.dot_dimension_numbers<[1], [0], [0], [1], [0, 0, 1, 1], [], []>} : vector<8x64xf32>, vector<64x128xf32>, vector<8x128xf32> -> vector<8x128xf32>
    %126 = arith.addf %125, %7 : vector<8x128xf32>
    %127 = math.tanh %126 : vector<8x128xf32>
    %128 = arith.mulf %127, %8 : vector<8x128xf32>
    %129 = arith.addf %128, %9 : vector<8x128xf32>
    %130 = vector.extract_strided_slice %129 {offsets = [0, 0], sizes = [8, 32], strides = [1, 1]} : vector<8x128xf32> to vector<8x32xf32>
    %131 = vector.extract_strided_slice %129 {offsets = [0, 32], sizes = [8, 32], strides = [1, 1]} : vector<8x128xf32> to vector<8x32xf32>
    %132 = vector.extract_strided_slice %129 {offsets = [0, 64], sizes = [8, 32], strides = [1, 1]} : vector<8x128xf32> to vector<8x32xf32>
    %133 = vector.extract_strided_slice %129 {offsets = [0, 96], sizes = [8, 32], strides = [1, 1]} : vector<8x128xf32> to vector<8x32xf32>
    %134 = arith.mulf %131, %106 : vector<8x32xf32>
    %135 = arith.mulf %130, %132 : vector<8x32xf32>
    %136 = arith.addf %134, %135 : vector<8x32xf32>
    %137 = math.tanh %136 : vector<8x32xf32>
    %138 = arith.mulf %133, %137 : vector<8x32xf32>
    %c4_i32 = arith.constant 4 : i32
    %139 = tpu.concatenate %138, %123 in 1 : vector<8x32xf32>, vector<8x32xf32> -> vector<8x64xf32>
    %cst_35 = arith.constant dense<0.000000e+00> : vector<8x128xf32>
    %140 = tpu.matmul %139, %1, %cst_35 {dimension_numbers = #tpu.dot_dimension_numbers<[1], [0], [0], [1], [0, 0, 1, 1], [], []>} : vector<8x64xf32>, vector<64x128xf32>, vector<8x128xf32> -> vector<8x128xf32>
    %141 = arith.addf %140, %5 : vector<8x128xf32>
    %142 = math.tanh %141 : vector<8x128xf32>
    %143 = arith.mulf %142, %8 : vector<8x128xf32>
    %144 = arith.addf %143, %9 : vector<8x128xf32>
    %145 = vector.extract_strided_slice %144 {offsets = [0, 0], sizes = [8, 32], strides = [1, 1]} : vector<8x128xf32> to vector<8x32xf32>
    %146 = vector.extract_strided_slice %144 {offsets = [0, 32], sizes = [8, 32], strides = [1, 1]} : vector<8x128xf32> to vector<8x32xf32>
    %147 = vector.extract_strided_slice %144 {offsets = [0, 64], sizes = [8, 32], strides = [1, 1]} : vector<8x128xf32> to vector<8x32xf32>
    %148 = vector.extract_strided_slice %144 {offsets = [0, 96], sizes = [8, 32], strides = [1, 1]} : vector<8x128xf32> to vector<8x32xf32>
    %149 = arith.mulf %146, %121 : vector<8x32xf32>
    %150 = arith.mulf %145, %147 : vector<8x32xf32>
    %151 = arith.addf %149, %150 : vector<8x32xf32>
    %152 = math.tanh %151 : vector<8x32xf32>
    %153 = arith.mulf %148, %152 : vector<8x32xf32>
    %154 = tpu.concatenate %153, %138 in 1 : vector<8x32xf32>, vector<8x32xf32> -> vector<8x64xf32>
    %cst_36 = arith.constant dense<0.000000e+00> : vector<8x128xf32>
    %155 = tpu.matmul %154, %3, %cst_36 {dimension_numbers = #tpu.dot_dimension_numbers<[1], [0], [0], [1], [0, 0, 1, 1], [], []>} : vector<8x64xf32>, vector<64x128xf32>, vector<8x128xf32> -> vector<8x128xf32>
    %156 = arith.addf %155, %7 : vector<8x128xf32>
    %157 = math.tanh %156 : vector<8x128xf32>
    %158 = arith.mulf %157, %8 : vector<8x128xf32>
    %159 = arith.addf %158, %9 : vector<8x128xf32>
    %160 = vector.extract_strided_slice %159 {offsets = [0, 0], sizes = [8, 32], strides = [1, 1]} : vector<8x128xf32> to vector<8x32xf32>
    %161 = vector.extract_strided_slice %159 {offsets = [0, 32], sizes = [8, 32], strides = [1, 1]} : vector<8x128xf32> to vector<8x32xf32>
    %162 = vector.extract_strided_slice %159 {offsets = [0, 64], sizes = [8, 32], strides = [1, 1]} : vector<8x128xf32> to vector<8x32xf32>
    %163 = vector.extract_strided_slice %159 {offsets = [0, 96], sizes = [8, 32], strides = [1, 1]} : vector<8x128xf32> to vector<8x32xf32>
    %164 = arith.mulf %161, %136 : vector<8x32xf32>
    %165 = arith.mulf %160, %162 : vector<8x32xf32>
    %166 = arith.addf %164, %165 : vector<8x32xf32>
    %167 = math.tanh %166 : vector<8x32xf32>
    %168 = arith.mulf %163, %167 : vector<8x32xf32>
    %c5_i32 = arith.constant 5 : i32
    %169 = tpu.concatenate %168, %153 in 1 : vector<8x32xf32>, vector<8x32xf32> -> vector<8x64xf32>
    %cst_37 = arith.constant dense<0.000000e+00> : vector<8x128xf32>
    %170 = tpu.matmul %169, %1, %cst_37 {dimension_numbers = #tpu.dot_dimension_numbers<[1], [0], [0], [1], [0, 0, 1, 1], [], []>} : vector<8x64xf32>, vector<64x128xf32>, vector<8x128xf32> -> vector<8x128xf32>
    %171 = arith.addf %170, %5 : vector<8x128xf32>
    %172 = math.tanh %171 : vector<8x128xf32>
    %173 = arith.mulf %172, %8 : vector<8x128xf32>
    %174 = arith.addf %173, %9 : vector<8x128xf32>
    %175 = vector.extract_strided_slice %174 {offsets = [0, 0], sizes = [8, 32], strides = [1, 1]} : vector<8x128xf32> to vector<8x32xf32>
    %176 = vector.extract_strided_slice %174 {offsets = [0, 32], sizes = [8, 32], strides = [1, 1]} : vector<8x128xf32> to vector<8x32xf32>
    %177 = vector.extract_strided_slice %174 {offsets = [0, 64], sizes = [8, 32], strides = [1, 1]} : vector<8x128xf32> to vector<8x32xf32>
    %178 = vector.extract_strided_slice %174 {offsets = [0, 96], sizes = [8, 32], strides = [1, 1]} : vector<8x128xf32> to vector<8x32xf32>
    %179 = arith.mulf %176, %151 : vector<8x32xf32>
    %180 = arith.mulf %175, %177 : vector<8x32xf32>
    %181 = arith.addf %179, %180 : vector<8x32xf32>
    %182 = math.tanh %181 : vector<8x32xf32>
    %183 = arith.mulf %178, %182 : vector<8x32xf32>
    %184 = tpu.concatenate %183, %168 in 1 : vector<8x32xf32>, vector<8x32xf32> -> vector<8x64xf32>
    %cst_38 = arith.constant dense<0.000000e+00> : vector<8x128xf32>
    %185 = tpu.matmul %184, %3, %cst_38 {dimension_numbers = #tpu.dot_dimension_numbers<[1], [0], [0], [1], [0, 0, 1, 1], [], []>} : vector<8x64xf32>, vector<64x128xf32>, vector<8x128xf32> -> vector<8x128xf32>
    %186 = arith.addf %185, %7 : vector<8x128xf32>
    %187 = math.tanh %186 : vector<8x128xf32>
    %188 = arith.mulf %187, %8 : vector<8x128xf32>
    %189 = arith.addf %188, %9 : vector<8x128xf32>
    %190 = vector.extract_strided_slice %189 {offsets = [0, 0], sizes = [8, 32], strides = [1, 1]} : vector<8x128xf32> to vector<8x32xf32>
    %191 = vector.extract_strided_slice %189 {offsets = [0, 32], sizes = [8, 32], strides = [1, 1]} : vector<8x128xf32> to vector<8x32xf32>
    %192 = vector.extract_strided_slice %189 {offsets = [0, 64], sizes = [8, 32], strides = [1, 1]} : vector<8x128xf32> to vector<8x32xf32>
    %193 = vector.extract_strided_slice %189 {offsets = [0, 96], sizes = [8, 32], strides = [1, 1]} : vector<8x128xf32> to vector<8x32xf32>
    %194 = arith.mulf %191, %166 : vector<8x32xf32>
    %195 = arith.mulf %190, %192 : vector<8x32xf32>
    %196 = arith.addf %194, %195 : vector<8x32xf32>
    %197 = math.tanh %196 : vector<8x32xf32>
    %198 = arith.mulf %193, %197 : vector<8x32xf32>
    %c6_i32 = arith.constant 6 : i32
    %199 = tpu.concatenate %198, %183 in 1 : vector<8x32xf32>, vector<8x32xf32> -> vector<8x64xf32>
    %cst_39 = arith.constant dense<0.000000e+00> : vector<8x128xf32>
    %200 = tpu.matmul %199, %1, %cst_39 {dimension_numbers = #tpu.dot_dimension_numbers<[1], [0], [0], [1], [0, 0, 1, 1], [], []>} : vector<8x64xf32>, vector<64x128xf32>, vector<8x128xf32> -> vector<8x128xf32>
    %201 = arith.addf %200, %5 : vector<8x128xf32>
    %202 = math.tanh %201 : vector<8x128xf32>
    %203 = arith.mulf %202, %8 : vector<8x128xf32>
    %204 = arith.addf %203, %9 : vector<8x128xf32>
    %205 = vector.extract_strided_slice %204 {offsets = [0, 0], sizes = [8, 32], strides = [1, 1]} : vector<8x128xf32> to vector<8x32xf32>
    %206 = vector.extract_strided_slice %204 {offsets = [0, 32], sizes = [8, 32], strides = [1, 1]} : vector<8x128xf32> to vector<8x32xf32>
    %207 = vector.extract_strided_slice %204 {offsets = [0, 64], sizes = [8, 32], strides = [1, 1]} : vector<8x128xf32> to vector<8x32xf32>
    %208 = vector.extract_strided_slice %204 {offsets = [0, 96], sizes = [8, 32], strides = [1, 1]} : vector<8x128xf32> to vector<8x32xf32>
    %209 = arith.mulf %206, %181 : vector<8x32xf32>
    %210 = arith.mulf %205, %207 : vector<8x32xf32>
    %211 = arith.addf %209, %210 : vector<8x32xf32>
    %212 = math.tanh %211 : vector<8x32xf32>
    %213 = arith.mulf %208, %212 : vector<8x32xf32>
    %214 = tpu.concatenate %213, %198 in 1 : vector<8x32xf32>, vector<8x32xf32> -> vector<8x64xf32>
    %cst_40 = arith.constant dense<0.000000e+00> : vector<8x128xf32>
    %215 = tpu.matmul %214, %3, %cst_40 {dimension_numbers = #tpu.dot_dimension_numbers<[1], [0], [0], [1], [0, 0, 1, 1], [], []>} : vector<8x64xf32>, vector<64x128xf32>, vector<8x128xf32> -> vector<8x128xf32>
    %216 = arith.addf %215, %7 : vector<8x128xf32>
    %217 = math.tanh %216 : vector<8x128xf32>
    %218 = arith.mulf %217, %8 : vector<8x128xf32>
    %219 = arith.addf %218, %9 : vector<8x128xf32>
    %220 = vector.extract_strided_slice %219 {offsets = [0, 0], sizes = [8, 32], strides = [1, 1]} : vector<8x128xf32> to vector<8x32xf32>
    %221 = vector.extract_strided_slice %219 {offsets = [0, 32], sizes = [8, 32], strides = [1, 1]} : vector<8x128xf32> to vector<8x32xf32>
    %222 = vector.extract_strided_slice %219 {offsets = [0, 64], sizes = [8, 32], strides = [1, 1]} : vector<8x128xf32> to vector<8x32xf32>
    %223 = vector.extract_strided_slice %219 {offsets = [0, 96], sizes = [8, 32], strides = [1, 1]} : vector<8x128xf32> to vector<8x32xf32>
    %224 = arith.mulf %221, %196 : vector<8x32xf32>
    %225 = arith.mulf %220, %222 : vector<8x32xf32>
    %226 = arith.addf %224, %225 : vector<8x32xf32>
    %227 = math.tanh %226 : vector<8x32xf32>
    %228 = arith.mulf %223, %227 : vector<8x32xf32>
    %c7_i32 = arith.constant 7 : i32
    %229 = tpu.concatenate %228, %213 in 1 : vector<8x32xf32>, vector<8x32xf32> -> vector<8x64xf32>
    %cst_41 = arith.constant dense<0.000000e+00> : vector<8x128xf32>
    %230 = tpu.matmul %229, %1, %cst_41 {dimension_numbers = #tpu.dot_dimension_numbers<[1], [0], [0], [1], [0, 0, 1, 1], [], []>} : vector<8x64xf32>, vector<64x128xf32>, vector<8x128xf32> -> vector<8x128xf32>
    %231 = arith.addf %230, %5 : vector<8x128xf32>
    %232 = math.tanh %231 : vector<8x128xf32>
    %233 = arith.mulf %232, %8 : vector<8x128xf32>
    %234 = arith.addf %233, %9 : vector<8x128xf32>
    %235 = vector.extract_strided_slice %234 {offsets = [0, 0], sizes = [8, 32], strides = [1, 1]} : vector<8x128xf32> to vector<8x32xf32>
    %236 = vector.extract_strided_slice %234 {offsets = [0, 32], sizes = [8, 32], strides = [1, 1]} : vector<8x128xf32> to vector<8x32xf32>
    %237 = vector.extract_strided_slice %234 {offsets = [0, 64], sizes = [8, 32], strides = [1, 1]} : vector<8x128xf32> to vector<8x32xf32>
    %238 = vector.extract_strided_slice %234 {offsets = [0, 96], sizes = [8, 32], strides = [1, 1]} : vector<8x128xf32> to vector<8x32xf32>
    %239 = arith.mulf %236, %211 : vector<8x32xf32>
    %240 = arith.mulf %235, %237 : vector<8x32xf32>
    %241 = arith.addf %239, %240 : vector<8x32xf32>
    %242 = math.tanh %241 : vector<8x32xf32>
    %243 = arith.mulf %238, %242 : vector<8x32xf32>
    %244 = tpu.concatenate %243, %228 in 1 : vector<8x32xf32>, vector<8x32xf32> -> vector<8x64xf32>
    %cst_42 = arith.constant dense<0.000000e+00> : vector<8x128xf32>
    %245 = tpu.matmul %244, %3, %cst_42 {dimension_numbers = #tpu.dot_dimension_numbers<[1], [0], [0], [1], [0, 0, 1, 1], [], []>} : vector<8x64xf32>, vector<64x128xf32>, vector<8x128xf32> -> vector<8x128xf32>
    %246 = arith.addf %245, %7 : vector<8x128xf32>
    %247 = math.tanh %246 : vector<8x128xf32>
    %248 = arith.mulf %247, %8 : vector<8x128xf32>
    %249 = arith.addf %248, %9 : vector<8x128xf32>
    %250 = vector.extract_strided_slice %249 {offsets = [0, 0], sizes = [8, 32], strides = [1, 1]} : vector<8x128xf32> to vector<8x32xf32>
    %251 = vector.extract_strided_slice %249 {offsets = [0, 32], sizes = [8, 32], strides = [1, 1]} : vector<8x128xf32> to vector<8x32xf32>
    %252 = vector.extract_strided_slice %249 {offsets = [0, 64], sizes = [8, 32], strides = [1, 1]} : vector<8x128xf32> to vector<8x32xf32>
    %253 = vector.extract_strided_slice %249 {offsets = [0, 96], sizes = [8, 32], strides = [1, 1]} : vector<8x128xf32> to vector<8x32xf32>
    %254 = arith.mulf %251, %226 : vector<8x32xf32>
    %255 = arith.mulf %250, %252 : vector<8x32xf32>
    %256 = arith.addf %254, %255 : vector<8x32xf32>
    %257 = math.tanh %256 : vector<8x32xf32>
    %258 = arith.mulf %253, %257 : vector<8x32xf32>
    %c0_43 = arith.constant 0 : index
    %c0_44 = arith.constant 0 : index
    %259 = vector.load %arg7[%c0_43, %c0_44] : memref<32x16xf32, #tpu.memory_space<vmem>>, vector<32x16xf32>
    %cst_45 = arith.constant dense<0.000000e+00> : vector<8x16xf32>
    %260 = tpu.matmul %258, %259, %cst_45 {dimension_numbers = #tpu.dot_dimension_numbers<[1], [0], [0], [1], [0, 0, 1, 1], [], []>} : vector<8x32xf32>, vector<32x16xf32>, vector<8x16xf32> -> vector<8x16xf32>
    %c0_46 = arith.constant 0 : index
    %c0_47 = arith.constant 0 : index
    %261 = vector.load %arg8[%c0_46, %c0_47] : memref<8x16xf32, #tpu.memory_space<vmem>>, vector<8x16xf32>
    %262 = arith.addf %260, %261 : vector<8x16xf32>
    %c0_48 = arith.constant 0 : index
    %c0_49 = arith.constant 0 : index
    %263 = vector.load %arg9[%c0_48, %c0_49] : memref<8x16xf32, #tpu.memory_space<vmem>>, vector<8x16xf32>
    tpu.vector_store %arg9[%c0_48, %c0_49], %262 {strides = array<i32>} : memref<8x16xf32, #tpu.memory_space<vmem>>, vector<8x16xf32>,
    return
  }
}

</mosaic_0001>

<bundles_post_ra>
// kernel: tpu_custom_call.1
= control target key start
LH: loop header
LB: loop body
LE: loop exit
PB: predicated region body
PF: predicated region fallthrough
CT: control target
= control target key end

     0   :  { %14 = vsyncpa [#allocation3], 0  ;;  %s1696_s0 = inlined_call_operand.hbm [shape: f32[8,32], index: 0, kind: input, shape index: {}]   ;;  %s1697_s1 = inlined_call_operand.vmem [shape: f32[2,8,32], index: 1, kind: input, shape index: {}]   ;;  %s1698_s2 = inlined_call_operand.vmem [shape: f32[2,8,32], index: 2, kind: input, shape index: {}]   ;;  %s1699_s3 = inlined_call_operand.hbm [shape: f32[2,64,128], index: 3, kind: input, shape index: {}]   ;;  %s1700_s4 = inlined_call_operand.vmem [shape: f32[2,8,128], index: 4, kind: input, shape index: {}]   ;;  %s1701_s5 = inlined_call_operand.hbm [shape: f32[8,128], index: 5, kind: input, shape index: {}]   ;;  %s1702_s6 = inlined_call_operand.hbm [shape: f32[8,128], index: 6, kind: input, shape index: {}]   ;;  %s1703_s7 = inlined_call_operand.vmem [shape: f32[32,16], index: 7, kind: input, shape index: {}]   ;;  %s1704_s8 = inlined_call_operand.hbm [shape: f32[8,16], index: 8, kind: input, shape index: {}]   ;;  %s1705_s9 = inlined_call_operand.hbm [shape: f32[8,16], index: 9, kind: output, shape index: {}]  }
   0x1   :  { %15 = vsyncpa [#allocation6], 0 }
   0x2   :  { %16 = vsyncpa [#allocation9], 0  ;;  %s37_s11 = sshll.u32 %s1699_s3, 4  ;;  %s38_s11 = int_to_ptr.hbm [resolvable:$true] %s37_s11 }
   0x3   :  { %17 = vsyncpa [#allocation4], 0  ;;  %s1253_s12 = smov [#allocation5]   ;;  %s64_s16 = sshll.u32 %s1702_s6, 4  ;;  %s65_s16 = int_to_ptr.hbm [resolvable:$true] %s64_s16 }
   0x4   :  { %s39_s13 = sshll.u32 %s1253_s12, 4  ;;  %s1254_s17 = smov 128   ;;  %s40_s13 = int_to_ptr.vmem [resolvable:$true] %s39_s13 }
   0x5   :  { %s1255_s18 = smov 8   ;;  %s1256_s19 = smov [#allocation8]  }
   0x6   :  { %45 = dma.hbm_to_vmem [thread:$0]  %s38_s11, 2048, %s40_s13, [#allocation6], %s1254_s17, %s1254_s17, %s1255_s18  }
   0x7   :  { %s66_s20 = sshll.u32 %s1256_s19, 4  ;;  %s23_s23 = sshll.u32 %s1696_s0, 4  ;;  %s67_s20 = int_to_ptr.vmem [resolvable:$true] %s66_s20  ;;  %s24_s23 = int_to_ptr.hbm [resolvable:$true] %s23_s23 }
   0x8   :  { %69 = dma.hbm_to_vmem [thread:$0]  %s65_s16, 128, %s67_s20, [#allocation9]  }
   0x9   :  { %s53_s25 = sshll.u32 %s1701_s5, 4  ;;  %s1257_s26 = smov [#allocation2]   ;;  %s54_s25 = int_to_ptr.hbm [resolvable:$true] %s53_s25 }
   0xa   :  { %s25_s27 = sshll.u32 %s1257_s26, 4  ;;  %s1258_s6 = smov [#allocation7]   ;;  %s26_s27 = int_to_ptr.vmem [resolvable:$true] %s25_s27 }
   0xb   :  { %28 = dma.hbm_to_vmem [thread:$0]  %s24_s23, 128, %s26_s27, [#allocation3]  }
   0xc   :  { %s55_s28 = sshll.u32 %s1258_s6, 4  ;;  %s77_s10 = sshll.u32 %s1704_s8, 4  ;;  %s56_s28 = int_to_ptr.vmem [resolvable:$true] %s55_s28  ;;  %s78_s10 = int_to_ptr.hbm [resolvable:$true] %s77_s10 }
   0xd   :  { %58 = dma.hbm_to_vmem [thread:$0]  %s54_s25, 128, %s56_s28, [#allocation6]  }
   0xe   :  { %s1259_s0 = smov [#allocation10]  }
   0xf   :  { %s79_s11 = sshll.u32 %s1259_s0, 4  ;;  %s80_s11 = int_to_ptr.vmem [resolvable:$true] %s79_s11 }
  0x10   :  { %82 = dma.hbm_to_vmem [thread:$0]  %s78_s10, 128, %s80_s11, [#allocation9]  }
  0x11   :  { %1245 = dma.done.wait [#allocation3], 128  }
  0x12   :  { %1246 = vsyncadd [#allocation3], 4294967168 }
  0x13   :  { %1247 = dma.done.wait [#allocation6], 2176  }
  0x14   :  { %1248 = vsyncadd [#allocation6], 4294965120 }
  0x15   :  { %1249 = dma.done.wait [#allocation9], 256  }
  0x16   :  { %1250 = vsyncadd [#allocation9], 4294967040  ;;  %v126_v0 = vld [vmem:[%s1697_s1] sm:$0xff]  ;;  %v1333_v2 = vld [vmem:[#allocation5 + $0x30] sm:$0xff]  ;;  %s1260_s8 = smov 32   ;;  %vm136_vm0 = vcmask 261120  }
  0x17   :  { %v1331_v1 = vld [vmem:[#allocation5 + $0x38] sm:$0xff]  ;;  %133 = vrot.lane.b32.xlu0 %v126_v0, %s1260_s8  ;;  %v1337_v3 = vld [vmem:[#allocation5 + $0x28] sm:$0xff]  ;;  %v1341_v4 = vld [vmem:[#allocation5 + $0x20] sm:$0xff]  ;;  %vm138_vm1 = vcmask 523264   ;;  %s1261_s17 = smov 64   ;;  %s1262_s6 = smov [#allocation11]  }
  0x18   :  { %150 = vmatpush.msra.mxu0 %v1331_v1  ;;  %261 = vmatpush.msra.mxu2 %v1331_v1  ;;  %v1345_v5 = vld [vmem:[#allocation5 + $0x18] sm:$0xff]  ;;  %v1349_v6 = vld [vmem:[#allocation5 + $0x10] sm:$0xff]  ;;  %v1353_v7 = vld [vmem:[#allocation5 + $0x8] sm:$0xff]  ;;  %s993_s28 = sshll.u32 %s1262_s6, 4  ;;  %s995_s10 = sshll.u32 %s1705_s9, 4  ;;  %vm986_vm2 = vcmask 130048   ;;  %s994_s28 = int_to_ptr.vmem [resolvable:$true] %s993_s28  ;;  %s996_s10 = int_to_ptr.hbm [resolvable:$true] %s995_s10 }
  0x19   :  { %v1360_v8 = vld [vmem:[#allocation5] sm:$0xff]  ;;  %v129_v9 = vld [vmem:[%s1698_s2] sm:$0xff]  ;;  %v1402_v18 = vld [vmem:[#allocation8] sm:$0xff] }
  0x1a   :  { %151 = vmatpush.msra.mxu0 %v1333_v2  ;;  %262 = vmatpush.msra.mxu2 %v1333_v2  ;;  %v125_v10 = vld [vmem:[#allocation2] sm:$0xff]  ;;  %v1400_v16 = vld [vmem:[#allocation7] sm:$0xff]  ;;  %v1418_v30 = vld [vmem:[#allocation5 + $0x70] sm:$0xff] }
  0x1b   :  { %166 = vrot.lane.b32.xlu1 %v129_v9, %s1260_s8  ;;  %v1397_v13 = vld [vmem:[%s1700_s4] sm:$0xff]  ;;  %v1008_v23 = vld [vmem:[%s1697_s1 + $0x8] sm:$0xff]  ;;  %v1422_v31 = vld [vmem:[#allocation5 + $0x68] sm:$0xff] }
  0x1c   :  { %152 = vmatpush.msra.mxu0 %v1337_v3  ;;  %263 = vmatpush.msra.mxu2 %v1337_v3  ;;  %v1416_v29 = vld [vmem:[#allocation5 + $0x78] sm:$0xff]  ;;  %v1426_v32 = vld [vmem:[#allocation5 + $0x60] sm:$0xff]  ;;  %v1434_v34 = vld [vmem:[#allocation5 + $0x50] sm:$0xff] }
  0x1d   :  { %206 = vmatpush.msra.mxu1 %v1416_v29  ;;  %312 = vmatpush.msra.mxu3 %v1416_v29  ;;  %v1430_v33 = vld [vmem:[#allocation5 + $0x58] sm:$0xff]  ;;  %v1438_v35 = vld [vmem:[#allocation5 + $0x48] sm:$0xff]  ;;  %v1445_v38 = vld [vmem:[#allocation5 + $0x40] sm:$0xff] }
  0x1e   :  { %153 = vmatpush.msra.mxu0 %v1341_v4  ;;  %264 = vmatpush.msra.mxu2 %v1341_v4  ;;  %v1009_v39 = vld [vmem:[%s1698_s2 + $0x8] sm:$0xff] }
  0x1f   :  { %207 = vmatpush.msra.mxu1 %v1418_v30  ;;  %313 = vmatpush.msra.mxu3 %v1418_v30  ;;  %v1482_v43 = vld [vmem:[%s1700_s4 + $0x8] sm:$0xff] }
  0x20   :  { %154 = vmatpush.msra.mxu0 %v1345_v5  ;;  %265 = vmatpush.msra.mxu2 %v1345_v5 }
  0x21   :  { %208 = vmatpush.msra.mxu1 %v1422_v31  ;;  %314 = vmatpush.msra.mxu3 %v1422_v31 }
  0x22   :  { %155 = vmatpush.msra.mxu0 %v1349_v6  ;;  %266 = vmatpush.msra.mxu2 %v1349_v6 }
  0x23   :  { %209 = vmatpush.msra.mxu1 %v1426_v32  ;;  %315 = vmatpush.msra.mxu3 %v1426_v32 }
  0x24   :  { %156 = vmatpush.msra.mxu0 %v1353_v7  ;;  %267 = vmatpush.msra.mxu2 %v1353_v7 }
  0x25   :  { %210 = vmatpush.msra.mxu1 %v1430_v33  ;;  %316 = vmatpush.msra.mxu3 %v1430_v33 }
  0x26   :  { %157 = vmatpush.msra.mxu0 %v1360_v8  ;;  %268 = vmatpush.msra.mxu2 %v1360_v8 }
  0x27   :  { %211 = vmatpush.msra.mxu1 %v1434_v34  ;;  %317 = vmatpush.msra.mxu3 %v1434_v34 }
  0x28   :  { %363 = vmatpush.msrb.mxu0 %v1331_v1  ;;  %465 = vmatpush.msrb.mxu2 %v1331_v1 }
  0x29   :  { %212 = vmatpush.msra.mxu1 %v1438_v35  ;;  %318 = vmatpush.msra.mxu3 %v1438_v35 }
  0x2a   :  { %364 = vmatpush.msrb.mxu0 %v1333_v2  ;;  %466 = vmatpush.msrb.mxu2 %v1333_v2 }
  0x2b   :  { %213 = vmatpush.msra.mxu1 %v1445_v38  ;;  %319 = vmatpush.msra.mxu3 %v1445_v38 }
  0x2c   :  { %365 = vmatpush.msrb.mxu0 %v1337_v3  ;;  %467 = vmatpush.msrb.mxu2 %v1337_v3 }
  0x2d   :  { %414 = vmatpush.msrb.mxu1 %v1416_v29  ;;  %516 = vmatpush.msrb.mxu3 %v1416_v29 }
  0x2e   :  { %366 = vmatpush.msrb.mxu0 %v1341_v4  ;;  %468 = vmatpush.msrb.mxu2 %v1341_v4 }
  0x2f   :  { %415 = vmatpush.msrb.mxu1 %v1418_v30  ;;  %517 = vmatpush.msrb.mxu3 %v1418_v30 }
  0x30   :  { %367 = vmatpush.msrb.mxu0 %v1345_v5  ;;  %469 = vmatpush.msrb.mxu2 %v1345_v5 }
  0x31   :  { %416 = vmatpush.msrb.mxu1 %v1422_v31  ;;  %518 = vmatpush.msrb.mxu3 %v1422_v31 }
  0x32   :  { %368 = vmatpush.msrb.mxu0 %v1349_v6  ;;  %470 = vmatpush.msrb.mxu2 %v1349_v6 }
  0x33   :  { %417 = vmatpush.msrb.mxu1 %v1426_v32  ;;  %519 = vmatpush.msrb.mxu3 %v1426_v32 }
  0x34   :  { %369 = vmatpush.msrb.mxu0 %v1353_v7  ;;  %471 = vmatpush.msrb.mxu2 %v1353_v7 }
  0x35   :  { %418 = vmatpush.msrb.mxu1 %v1430_v33  ;;  %520 = vmatpush.msrb.mxu3 %v1430_v33 }
  0x36   :  { %370 = vmatpush.msrb.mxu0 %v1360_v8  ;;  %472 = vmatpush.msrb.mxu2 %v1360_v8 }
  0x37   :  { %419 = vmatpush.msrb.mxu1 %v1434_v34  ;;  %521 = vmatpush.msrb.mxu3 %v1434_v34 }
  0x39   :  { %420 = vmatpush.msrb.mxu1 %v1438_v35  ;;  %522 = vmatpush.msrb.mxu3 %v1438_v35 }
  0x3b   :  { %421 = vmatpush.msrb.mxu1 %v1445_v38  ;;  %523 = vmatpush.msrb.mxu3 %v1445_v38 }
  0x89   :  { %v134_v11 = vpop.permute.xlu0 %133 }
  0x8a   :  { %v137_v12 = vsel %vm136_vm0, %v125_v10, %v134_v11 }
  0x8b   :  { %1010 = vmatmul.msk.f32.vlgmr.msra.gmra.mxu0 %vm138_vm1, %v137_v12 }
  0x8c   :  { %567 = vmatpush.msra.mxu0 %v1331_v1 }
  0x8d   :  { %v167_v24 = vpop.permute.xlu1 %166 }
  0x8e   :  { %568 = vmatpush.msra.mxu0 %v1333_v2 }
  0x90   :  { %569 = vmatpush.msra.mxu0 %v1337_v3 }
  0x92   :  { %570 = vmatpush.msra.mxu0 %v1341_v4 }
  0x94   :  { %571 = vmatpush.msra.mxu0 %v1345_v5 }
  0x96   :  { %572 = vmatpush.msra.mxu0 %v1349_v6 }
  0x98   :  { %573 = vmatpush.msra.mxu0 %v1353_v7 }
  0x9a   :  { %574 = vmatpush.msra.mxu0 %v1360_v8 }
 0x108   :  { %v159_v14 = vpop.f32.mrf.mxu0 }
 0x109   :  { %v160_v15 = vadd.f32 %v159_v14, %v1397_v13 }
 0x10b   :  { %1037 = vtanh.f32 %v160_v15 }
 0x111   :  { %v1038_v17 = vpop.eup %1037 }
 0x112   :  { %v163_v19 = vmul.f32 %v1038_v17, %v1400_v16 }
 0x114   :  { %v164_v20 = vadd.f32 %v163_v19, %v1402_v18 }
 0x116   :  { %171 = vrot.lane.b32.xlu0 %v164_v20, %s1261_s17  ;;  %v169_v25 = vmul.f32 %v167_v24, %v164_v20 }
 0x11e   :  { %191 = vrot.lane.b32.xlu0 %v1008_v23, %s1260_s8 }
 0x188   :  { %v172_v21 = vpop.permute.xlu0 %171 }
 0x189   :  { %v174_v22 = vmul.f32 %v172_v21, %v164_v20 }
 0x18b   :  { %176 = vrot.lane.b32.xlu1 %v174_v22, %s1260_s8 }
 0x190   :  { %v192_v40 = vpop.permute.xlu0 %191 }
 0x1fd   :  { %v177_v26 = vpop.permute.xlu1 %176 }
 0x1fe   :  { %v1412_v27 = vadd.f32 %v177_v26, %v169_v25 }
 0x200   :  { %1039 = vtanh.f32 %v1412_v27 }
 0x206   :  { %v1040_v28 = vpop.eup %1039 }
 0x207   :  { %182 = vrot.lane.b32.xlu2 %v1040_v28, %s1261_s17 }
 0x261   :  { %v183_v36 = vpop.permute.xlu2 %182 }
 0x262   :  { %v185_v37 = vmul.f32 %v183_v36, %v164_v20 }
 0x264   :  { %187 = vrot.lane.b32.xlu2 %v185_v37, %s1260_s8 }
 0x26c   :  { %222 = vrot.lane.b32.xlu2 %v1009_v39, %s1260_s8 }
 0x2be   :  { %v188_v41 = vpop.permute.xlu2 %187 }
 0x2bf   :  { %v194_v42 = vsel %vm136_vm0, %v188_v41, %v192_v40 }
 0x2c0   :  { %1011 = vmatmul.msk.f32.vlgmr.msra.gmra.mxu1 %vm138_vm1, %v194_v42 }
 0x2c1   :  { %618 = vmatpush.msra.mxu1 %v1416_v29 }
 0x2c3   :  { %619 = vmatpush.msra.mxu1 %v1418_v30 }
 0x2c5   :  { %620 = vmatpush.msra.mxu1 %v1422_v31 }
 0x2c6   :  { %v223_v51 = vpop.permute.xlu2 %222 }
 0x2c7   :  { %621 = vmatpush.msra.mxu1 %v1426_v32 }
 0x2c9   :  { %622 = vmatpush.msra.mxu1 %v1430_v33 }
 0x2cb   :  { %623 = vmatpush.msra.mxu1 %v1434_v34 }
 0x2cd   :  { %624 = vmatpush.msra.mxu1 %v1438_v35 }
 0x2cf   :  { %625 = vmatpush.msra.mxu1 %v1445_v38 }
 0x33d   :  { %v215_v44 = vpop.f32.mrf.mxu1 }
 0x33e   :  { %v216_v45 = vadd.f32 %v1482_v43, %v215_v44 }
 0x340   :  { %1041 = vtanh.f32 %v216_v45 }
 0x346   :  { %v1042_v46 = vpop.eup %1041 }
 0x347   :  { %v219_v47 = vmul.f32 %v1042_v46, %v1400_v16 }
 0x349   :  { %v220_v48 = vadd.f32 %v219_v47, %v1402_v18 }
 0x34b   :  { %227 = vrot.lane.b32.xlu1 %v220_v48, %s1261_s17  ;;  %v225_v52 = vmul.f32 %v223_v51, %v220_v48 }
 0x3bd   :  { %v228_v49 = vpop.permute.xlu1 %227 }
 0x3be   :  { %v230_v50 = vmul.f32 %v228_v49, %v220_v48 }
 0x3c0   :  { %232 = vrot.lane.b32.xlu0 %v230_v50, %s1260_s8 }
 0x3c8   :  { %246 = vrot.lane.b32.xlu0 %v185_v37, %s1261_s17 }
 0x432   :  { %v233_v53 = vpop.permute.xlu0 %232 }
 0x433   :  { %v235_v54 = vadd.f32 %v233_v53, %v225_v52 }
 0x435   :  { %1043 = vtanh.f32 %v235_v54 }
 0x43a   :  { %v247_v58 = vpop.permute.xlu0 %246 }
 0x43b   :  { %v1044_v55 = vpop.eup %1043 }
 0x43c   :  { %238 = vrot.lane.b32.xlu1 %v1044_v55, %s1261_s17 }
 0x4ae   :  { %v239_v56 = vpop.permute.xlu1 %238 }
 0x4af   :  { %v241_v57 = vmul.f32 %v239_v56, %v220_v48 }
 0x4b1   :  { %243 = vrot.lane.b32.xlu2 %v241_v57, %s1260_s8 }
 0x50b   :  { %v244_v59 = vpop.permute.xlu2 %243 }
 0x50c   :  { %v249_v60 = vsel %vm136_vm0, %v244_v59, %v247_v58 }
 0x50d   :  { %1012 = vmatmul.msk.f32.vlgmr.msra.gmra.mxu2 %vm138_vm1, %v249_v60 }
 0x50e   :  { %669 = vmatpush.msra.mxu2 %v1331_v1 }
 0x510   :  { %670 = vmatpush.msra.mxu2 %v1333_v2 }
 0x512   :  { %671 = vmatpush.msra.mxu2 %v1337_v3 }
 0x514   :  { %672 = vmatpush.msra.mxu2 %v1341_v4 }
 0x516   :  { %673 = vmatpush.msra.mxu2 %v1345_v5 }
 0x518   :  { %674 = vmatpush.msra.mxu2 %v1349_v6 }
 0x51a   :  { %675 = vmatpush.msra.mxu2 %v1353_v7 }
 0x51c   :  { %676 = vmatpush.msra.mxu2 %v1360_v8 }
 0x590   :  { %v270_v61 = vpop.f32.mrf.mxu2 }
 0x591   :  { %v271_v62 = vadd.f32 %v270_v61, %v1397_v13 }
 0x593   :  { %1045 = vtanh.f32 %v271_v62 }
 0x599   :  { %v1046_v63 = vpop.eup %1045 }
 0x59a   :  { %v274_v0 = vmul.f32 %v1046_v63, %v1400_v16 }
 0x59c   :  { %v275_v9 = vadd.f32 %v274_v0, %v1402_v18 }
 0x59e   :  { %278 = vrot.lane.b32.xlu1 %v275_v9, %s1261_s17  ;;  %v276_v12 = vmul.f32 %v275_v9, %v1412_v27 }
 0x610   :  { %v279_v10 = vpop.permute.xlu1 %278 }
 0x611   :  { %v281_v11 = vmul.f32 %v279_v10, %v275_v9 }
 0x613   :  { %283 = vrot.lane.b32.xlu2 %v281_v11, %s1260_s8 }
 0x61b   :  { %297 = vrot.lane.b32.xlu2 %v241_v57, %s1261_s17 }
 0x66d   :  { %v284_v14 = vpop.permute.xlu2 %283 }
 0x66e   :  { %v286_v15 = vadd.f32 %v284_v14, %v276_v12 }
 0x670   :  { %1047 = vtanh.f32 %v286_v15 }
 0x675   :  { %v298_v21 = vpop.permute.xlu2 %297 }
 0x676   :  { %v1048_v17 = vpop.eup %1047 }
 0x677   :  { %289 = vrot.lane.b32.xlu0 %v1048_v17, %s1261_s17 }
 0x6e9   :  { %v290_v19 = vpop.permute.xlu0 %289 }
 0x6ea   :  { %v292_v20 = vmul.f32 %v290_v19, %v275_v9 }
 0x6ec   :  { %294 = vrot.lane.b32.xlu1 %v292_v20, %s1260_s8 }
 0x75e   :  { %v295_v22 = vpop.permute.xlu1 %294 }
 0x75f   :  { %v300_v23 = vsel %vm136_vm0, %v295_v22, %v298_v21 }
 0x760   :  { %1013 = vmatmul.msk.f32.vlgmr.msra.gmra.mxu3 %vm138_vm1, %v300_v23 }
 0x761   :  { %720 = vmatpush.msra.mxu3 %v1416_v29 }
 0x763   :  { %721 = vmatpush.msra.mxu3 %v1418_v30 }
 0x765   :  { %722 = vmatpush.msra.mxu3 %v1422_v31 }
 0x767   :  { %723 = vmatpush.msra.mxu3 %v1426_v32 }
 0x769   :  { %724 = vmatpush.msra.mxu3 %v1430_v33 }
 0x76b   :  { %725 = vmatpush.msra.mxu3 %v1434_v34 }
 0x76d   :  { %726 = vmatpush.msra.mxu3 %v1438_v35 }
 0x76f   :  { %727 = vmatpush.msra.mxu3 %v1445_v38 }
 0x7e3   :  { %v321_v24 = vpop.f32.mrf.mxu3 }
 0x7e4   :  { %v322_v25 = vadd.f32 %v1482_v43, %v321_v24 }
 0x7e6   :  { %1049 = vtanh.f32 %v322_v25 }
 0x7ec   :  { %v1050_v26 = vpop.eup %1049 }
 0x7ed   :  { %v325_v27 = vmul.f32 %v1050_v26, %v1400_v16 }
 0x7ef   :  { %v326_v28 = vadd.f32 %v325_v27, %v1402_v18 }
 0x7f1   :  { %329 = vrot.lane.b32.xlu0 %v326_v28, %s1261_s17  ;;  %v327_v39 = vmul.f32 %v326_v28, %v235_v54 }
 0x863   :  { %v330_v36 = vpop.permute.xlu0 %329 }
 0x864   :  { %v332_v37 = vmul.f32 %v330_v36, %v326_v28 }
 0x866   :  { %334 = vrot.lane.b32.xlu1 %v332_v37, %s1260_s8 }
 0x86e   :  { %348 = vrot.lane.b32.xlu1 %v292_v20, %s1261_s17 }
 0x8d8   :  { %v335_v40 = vpop.permute.xlu1 %334 }
 0x8d9   :  { %v337_v41 = vadd.f32 %v335_v40, %v327_v39 }
 0x8db   :  { %1051 = vtanh.f32 %v337_v41 }
 0x8e0   :  { %v349_v46 = vpop.permute.xlu1 %348 }
 0x8e1   :  { %v1052_v42 = vpop.eup %1051 }
 0x8e2   :  { %340 = vrot.lane.b32.xlu2 %v1052_v42, %s1261_s17 }
 0x93c   :  { %v341_v44 = vpop.permute.xlu2 %340 }
 0x93d   :  { %v343_v45 = vmul.f32 %v341_v44, %v326_v28 }
 0x93f   :  { %345 = vrot.lane.b32.xlu0 %v343_v45, %s1260_s8 }
 0x9b1   :  { %v346_v47 = vpop.permute.xlu0 %345 }
 0x9b2   :  { %v351_v48 = vsel %vm136_vm0, %v346_v47, %v349_v46 }
 0x9b3   :  { %1014 = vmatmul.msk.f32.vlgmr.msrb.gmra.mxu0 %vm138_vm1, %v351_v48 }
 0x9b4   :  { %771 = vmatpush.msrb.mxu0 %v1331_v1 }
 0x9b6   :  { %772 = vmatpush.msrb.mxu0 %v1333_v2 }
 0x9b8   :  { %773 = vmatpush.msrb.mxu0 %v1337_v3 }
 0x9ba   :  { %774 = vmatpush.msrb.mxu0 %v1341_v4 }
 0x9bc   :  { %775 = vmatpush.msrb.mxu0 %v1345_v5 }
 0x9be   :  { %776 = vmatpush.msrb.mxu0 %v1349_v6 }
 0x9c0   :  { %777 = vmatpush.msrb.mxu0 %v1353_v7 }
 0x9c2   :  { %778 = vmatpush.msrb.mxu0 %v1360_v8 }
 0xa30   :  { %v372_v49 = vpop.f32.mrf.mxu0 }
 0xa31   :  { %v373_v50 = vadd.f32 %v372_v49, %v1397_v13 }
 0xa33   :  { %1053 = vtanh.f32 %v373_v50 }
 0xa39   :  { %v1054_v51 = vpop.eup %1053 }
 0xa3a   :  { %v376_v52 = vmul.f32 %v1054_v51, %v1400_v16 }
 0xa3c   :  { %v377_v53 = vadd.f32 %v376_v52, %v1402_v18 }
 0xa3e   :  { %380 = vrot.lane.b32.xlu2 %v377_v53, %s1261_s17  ;;  %v378_v56 = vmul.f32 %v377_v53, %v286_v15 }
 0xa98   :  { %v381_v54 = vpop.permute.xlu2 %380 }
 0xa99   :  { %v383_v55 = vmul.f32 %v381_v54, %v377_v53 }
 0xa9b   :  { %385 = vrot.lane.b32.xlu0 %v383_v55, %s1260_s8 }
 0xaa3   :  { %399 = vrot.lane.b32.xlu0 %v343_v45, %s1261_s17 }
 0xb0d   :  { %v386_v57 = vpop.permute.xlu0 %385 }
 0xb0e   :  { %v388_v58 = vadd.f32 %v386_v57, %v378_v56 }
 0xb10   :  { %1055 = vtanh.f32 %v388_v58 }
 0xb15   :  { %v400_v62 = vpop.permute.xlu0 %399 }
 0xb16   :  { %v1056_v59 = vpop.eup %1055 }
 0xb17   :  { %391 = vrot.lane.b32.xlu1 %v1056_v59, %s1261_s17 }
 0xb89   :  { %v392_v60 = vpop.permute.xlu1 %391 }
 0xb8a   :  { %v394_v61 = vmul.f32 %v392_v60, %v377_v53 }
 0xb8c   :  { %396 = vrot.lane.b32.xlu2 %v394_v61, %s1260_s8 }
 0xbe6   :  { %v397_v63 = vpop.permute.xlu2 %396 }
 0xbe7   :  { %v402_v0 = vsel %vm136_vm0, %v397_v63, %v400_v62 }
 0xbe8   :  { %1015 = vmatmul.msk.f32.vlgmr.msrb.gmra.mxu1 %vm138_vm1, %v402_v0 }
 0xbe9   :  { %822 = vmatpush.msrb.mxu1 %v1416_v29 }
 0xbeb   :  { %823 = vmatpush.msrb.mxu1 %v1418_v30 }
 0xbed   :  { %824 = vmatpush.msrb.mxu1 %v1422_v31 }
 0xbef   :  { %825 = vmatpush.msrb.mxu1 %v1426_v32 }
 0xbf1   :  { %826 = vmatpush.msrb.mxu1 %v1430_v33 }
 0xbf3   :  { %827 = vmatpush.msrb.mxu1 %v1434_v34 }
 0xbf5   :  { %828 = vmatpush.msrb.mxu1 %v1438_v35 }
 0xbf7   :  { %829 = vmatpush.msrb.mxu1 %v1445_v38 }
 0xc65   :  { %v423_v9 = vpop.f32.mrf.mxu1 }
 0xc66   :  { %v424_v10 = vadd.f32 %v1482_v43, %v423_v9 }
 0xc68   :  { %1057 = vtanh.f32 %v424_v10 }
 0xc6e   :  { %v1058_v11 = vpop.eup %1057 }
 0xc6f   :  { %v427_v12 = vmul.f32 %v1058_v11, %v1400_v16 }
 0xc71   :  { %v428_v14 = vadd.f32 %v427_v12, %v1402_v18 }
 0xc73   :  { %431 = vrot.lane.b32.xlu1 %v428_v14, %s1261_s17  ;;  %v429_v19 = vmul.f32 %v428_v14, %v337_v41 }
 0xce5   :  { %v432_v15 = vpop.permute.xlu1 %431 }
 0xce6   :  { %v434_v17 = vmul.f32 %v432_v15, %v428_v14 }
 0xce8   :  { %436 = vrot.lane.b32.xlu2 %v434_v17, %s1260_s8 }
 0xcf0   :  { %450 = vrot.lane.b32.xlu2 %v394_v61, %s1261_s17 }
 0xd42   :  { %v437_v20 = vpop.permute.xlu2 %436 }
 0xd43   :  { %v439_v21 = vadd.f32 %v437_v20, %v429_v19 }
 0xd45   :  { %1059 = vtanh.f32 %v439_v21 }
 0xd4a   :  { %v451_v25 = vpop.permute.xlu2 %450 }
 0xd4b   :  { %v1060_v22 = vpop.eup %1059 }
 0xd4c   :  { %442 = vrot.lane.b32.xlu0 %v1060_v22, %s1261_s17 }
 0xdbe   :  { %v443_v23 = vpop.permute.xlu0 %442 }
 0xdbf   :  { %v445_v24 = vmul.f32 %v443_v23, %v428_v14 }
 0xdc1   :  { %447 = vrot.lane.b32.xlu1 %v445_v24, %s1260_s8 }
 0xe33   :  { %v448_v26 = vpop.permute.xlu1 %447 }
 0xe34   :  { %v453_v27 = vsel %vm136_vm0, %v448_v26, %v451_v25 }
 0xe35   :  { %1016 = vmatmul.msk.f32.vlgmr.msrb.gmra.mxu2 %vm138_vm1, %v453_v27 }
 0xe36   :  { %873 = vmatpush.msrb.mxu2 %v1331_v1 }
 0xe38   :  { %874 = vmatpush.msrb.mxu2 %v1333_v2 }
 0xe3a   :  { %875 = vmatpush.msrb.mxu2 %v1337_v3 }
 0xe3c   :  { %876 = vmatpush.msrb.mxu2 %v1341_v4 }
 0xe3e   :  { %877 = vmatpush.msrb.mxu2 %v1345_v5 }
 0xe40   :  { %878 = vmatpush.msrb.mxu2 %v1349_v6 }
 0xe42   :  { %879 = vmatpush.msrb.mxu2 %v1353_v7 }
 0xe44   :  { %880 = vmatpush.msrb.mxu2 %v1360_v8 }
 0xeb8   :  { %v474_v28 = vpop.f32.mrf.mxu2 }
 0xeb9   :  { %v475_v36 = vadd.f32 %v474_v28, %v1397_v13 }
 0xebb   :  { %1061 = vtanh.f32 %v475_v36 }
 0xec1   :  { %v1062_v37 = vpop.eup %1061 }
 0xec2   :  { %v478_v1 = vmul.f32 %v1062_v37, %v1400_v16 }
 0xec4   :  { %v479_v2 = vadd.f32 %v478_v1, %v1402_v18 }
 0xec6   :  { %482 = vrot.lane.b32.xlu0 %v479_v2, %s1261_s17  ;;  %v480_v5 = vmul.f32 %v479_v2, %v388_v58 }
 0xf38   :  { %v483_v3 = vpop.permute.xlu0 %482 }
 0xf39   :  { %v485_v4 = vmul.f32 %v483_v3, %v479_v2 }
 0xf3b   :  { %487 = vrot.lane.b32.xlu1 %v485_v4, %s1260_s8 }
 0xf43   :  { %501 = vrot.lane.b32.xlu1 %v445_v24, %s1261_s17 }
 0xfad   :  { %v488_v6 = vpop.permute.xlu1 %487 }
 0xfae   :  { %v490_v7 = vadd.f32 %v488_v6, %v480_v5 }
 0xfb0   :  { %1063 = vtanh.f32 %v490_v7 }
 0xfb5   :  { %v502_v41 = vpop.permute.xlu1 %501 }
 0xfb6   :  { %v1064_v8 = vpop.eup %1063 }
 0xfb7   :  { %493 = vrot.lane.b32.xlu2 %v1064_v8, %s1261_s17 }
0x1011   :  { %v494_v39 = vpop.permute.xlu2 %493 }
0x1012   :  { %v496_v40 = vmul.f32 %v494_v39, %v479_v2 }
0x1014   :  { %498 = vrot.lane.b32.xlu0 %v496_v40, %s1260_s8 }
0x1086   :  { %v499_v42 = vpop.permute.xlu0 %498 }
0x1087   :  { %v504_v44 = vsel %vm136_vm0, %v499_v42, %v502_v41 }
0x1088   :  { %1017 = vmatmul.msk.f32.vlgmr.msrb.gmra.mxu3 %vm138_vm1, %v504_v44 }
0x1089   :  { %924 = vmatpush.msrb.mxu3 %v1416_v29 }
0x108b   :  { %925 = vmatpush.msrb.mxu3 %v1418_v30 }
0x108d   :  { %926 = vmatpush.msrb.mxu3 %v1422_v31 }
0x108f   :  { %927 = vmatpush.msrb.mxu3 %v1426_v32 }
0x1091   :  { %928 = vmatpush.msrb.mxu3 %v1430_v33 }
0x1093   :  { %929 = vmatpush.msrb.mxu3 %v1434_v34 }
0x1095   :  { %930 = vmatpush.msrb.mxu3 %v1438_v35 }
0x1097   :  { %931 = vmatpush.msrb.mxu3 %v1445_v38 }
0x110b   :  { %v525_v45 = vpop.f32.mrf.mxu3 }
0x110c   :  { %v526_v46 = vadd.f32 %v1482_v43, %v525_v45 }
0x110e   :  { %1065 = vtanh.f32 %v526_v46 }
0x1114   :  { %v1066_v47 = vpop.eup %1065 }
0x1115   :  { %v529_v29 = vmul.f32 %v1066_v47, %v1400_v16 }
0x1117   :  { %v530_v30 = vadd.f32 %v529_v29, %v1402_v18 }
0x1119   :  { %533 = vrot.lane.b32.xlu2 %v530_v30, %s1261_s17  ;;  %v531_v33 = vmul.f32 %v530_v30, %v439_v21 }
0x1173   :  { %v534_v31 = vpop.permute.xlu2 %533 }
0x1174   :  { %v536_v32 = vmul.f32 %v534_v31, %v530_v30 }
0x1176   :  { %538 = vrot.lane.b32.xlu0 %v536_v32, %s1260_s8 }
0x117e   :  { %552 = vrot.lane.b32.xlu0 %v496_v40, %s1261_s17 }
0x11e8   :  { %v539_v34 = vpop.permute.xlu0 %538 }
0x11e9   :  { %v541_v35 = vadd.f32 %v539_v34, %v531_v33 }
0x11eb   :  { %1067 = vtanh.f32 %v541_v35 }
0x11f0   :  { %v553_v50 = vpop.permute.xlu0 %552 }
0x11f1   :  { %v1068_v38 = vpop.eup %1067 }
0x11f2   :  { %544 = vrot.lane.b32.xlu1 %v1068_v38, %s1261_s17 }
0x1264   :  { %v545_v48 = vpop.permute.xlu1 %544 }
0x1265   :  { %v547_v49 = vmul.f32 %v545_v48, %v530_v30 }
0x1267   :  { %549 = vrot.lane.b32.xlu2 %v547_v49, %s1260_s8 }
0x12c1   :  { %v550_v51 = vpop.permute.xlu2 %549 }
0x12c2   :  { %v555_v52 = vsel %vm136_vm0, %v550_v51, %v553_v50 }
0x12c3   :  { %1018 = vmatmul.msk.f32.vlgmr.msra.gmra.mxu0 %vm138_vm1, %v555_v52 }
0x1340   :  { %v576_v53 = vpop.f32.mrf.mxu0 }
0x1341   :  { %v577_v54 = vadd.f32 %v576_v53, %v1397_v13 }
0x1343   :  { %1069 = vtanh.f32 %v577_v54 }
0x1349   :  { %v1070_v55 = vpop.eup %1069 }
0x134a   :  { %v580_v56 = vmul.f32 %v1070_v55, %v1400_v16 }
0x134c   :  { %v581_v57 = vadd.f32 %v580_v56, %v1402_v18 }
0x134e   :  { %584 = vrot.lane.b32.xlu1 %v581_v57, %s1261_s17  ;;  %v582_v60 = vmul.f32 %v581_v57, %v490_v7 }
0x13c0   :  { %v585_v58 = vpop.permute.xlu1 %584 }
0x13c1   :  { %v587_v59 = vmul.f32 %v585_v58, %v581_v57 }
0x13c3   :  { %589 = vrot.lane.b32.xlu2 %v587_v59, %s1260_s8 }
0x13cb   :  { %603 = vrot.lane.b32.xlu2 %v547_v49, %s1261_s17 }
0x141d   :  { %v590_v61 = vpop.permute.xlu2 %589 }
0x141e   :  { %v592_v62 = vadd.f32 %v590_v61, %v582_v60 }
0x1420   :  { %1071 = vtanh.f32 %v592_v62 }
0x1425   :  { %v604_v10 = vpop.permute.xlu2 %603 }
0x1426   :  { %v1072_v63 = vpop.eup %1071 }
0x1427   :  { %595 = vrot.lane.b32.xlu0 %v1072_v63, %s1261_s17 }
0x1499   :  { %v596_v0 = vpop.permute.xlu0 %595 }
0x149a   :  { %v598_v9 = vmul.f32 %v596_v0, %v581_v57 }
0x149c   :  { %600 = vrot.lane.b32.xlu1 %v598_v9, %s1260_s8 }
0x150e   :  { %v601_v11 = vpop.permute.xlu1 %600 }
0x150f   :  { %v606_v12 = vsel %vm136_vm0, %v601_v11, %v604_v10 }
0x1510   :  { %1019 = vmatmul.msk.f32.vlgmr.msra.gmra.mxu1 %vm138_vm1, %v606_v12 }
0x158d   :  { %v627_v14 = vpop.f32.mrf.mxu1 }
0x158e   :  { %v628_v15 = vadd.f32 %v1482_v43, %v627_v14 }
0x1590   :  { %1073 = vtanh.f32 %v628_v15 }
0x1596   :  { %v1074_v17 = vpop.eup %1073 }
0x1597   :  { %v631_v19 = vmul.f32 %v1074_v17, %v1400_v16 }
0x1599   :  { %v632_v20 = vadd.f32 %v631_v19, %v1402_v18 }
0x159b   :  { %635 = vrot.lane.b32.xlu0 %v632_v20, %s1261_s17  ;;  %v633_v23 = vmul.f32 %v632_v20, %v541_v35 }
0x160d   :  { %v636_v21 = vpop.permute.xlu0 %635 }
0x160e   :  { %v638_v22 = vmul.f32 %v636_v21, %v632_v20 }
0x1610   :  { %640 = vrot.lane.b32.xlu1 %v638_v22, %s1260_s8 }
0x1618   :  { %654 = vrot.lane.b32.xlu1 %v598_v9, %s1261_s17 }
0x1682   :  { %v641_v24 = vpop.permute.xlu1 %640 }
0x1683   :  { %v643_v25 = vadd.f32 %v641_v24, %v633_v23 }
0x1685   :  { %1075 = vtanh.f32 %v643_v25 }
0x168a   :  { %v655_v36 = vpop.permute.xlu1 %654 }
0x168b   :  { %v1076_v26 = vpop.eup %1075 }
0x168c   :  { %646 = vrot.lane.b32.xlu2 %v1076_v26, %s1261_s17 }
0x16e6   :  { %v647_v27 = vpop.permute.xlu2 %646 }
0x16e7   :  { %v649_v28 = vmul.f32 %v647_v27, %v632_v20 }
0x16e9   :  { %651 = vrot.lane.b32.xlu0 %v649_v28, %s1260_s8 }
0x175b   :  { %v652_v37 = vpop.permute.xlu0 %651 }
0x175c   :  { %v657_v1 = vsel %vm136_vm0, %v652_v37, %v655_v36 }
0x175d   :  { %1020 = vmatmul.msk.f32.vlgmr.msra.gmra.mxu2 %vm138_vm1, %v657_v1 }
0x17e0   :  { %v678_v2 = vpop.f32.mrf.mxu2 }
0x17e1   :  { %v679_v3 = vadd.f32 %v678_v2, %v1397_v13 }
0x17e3   :  { %1077 = vtanh.f32 %v679_v3 }
0x17e9   :  { %v1078_v4 = vpop.eup %1077 }
0x17ea   :  { %v682_v5 = vmul.f32 %v1078_v4, %v1400_v16 }
0x17ec   :  { %v683_v6 = vadd.f32 %v682_v5, %v1402_v18 }
0x17ee   :  { %686 = vrot.lane.b32.xlu2 %v683_v6, %s1261_s17  ;;  %v684_v39 = vmul.f32 %v683_v6, %v592_v62 }
0x1848   :  { %v687_v7 = vpop.permute.xlu2 %686 }
0x1849   :  { %v689_v8 = vmul.f32 %v687_v7, %v683_v6 }
0x184b   :  { %691 = vrot.lane.b32.xlu0 %v689_v8, %s1260_s8 }
0x1853   :  { %705 = vrot.lane.b32.xlu0 %v649_v28, %s1261_s17 }
0x18bd   :  { %v692_v40 = vpop.permute.xlu0 %691 }
0x18be   :  { %v694_v41 = vadd.f32 %v692_v40, %v684_v39 }
0x18c0   :  { %1079 = vtanh.f32 %v694_v41 }
0x18c5   :  { %v706_v46 = vpop.permute.xlu0 %705 }
0x18c6   :  { %v1080_v42 = vpop.eup %1079 }
0x18c7   :  { %697 = vrot.lane.b32.xlu1 %v1080_v42, %s1261_s17 }
0x1939   :  { %v698_v44 = vpop.permute.xlu1 %697 }
0x193a   :  { %v700_v45 = vmul.f32 %v698_v44, %v683_v6 }
0x193c   :  { %702 = vrot.lane.b32.xlu2 %v700_v45, %s1260_s8 }
0x1996   :  { %v703_v47 = vpop.permute.xlu2 %702 }
0x1997   :  { %v708_v29 = vsel %vm136_vm0, %v703_v47, %v706_v46 }
0x1998   :  { %1021 = vmatmul.msk.f32.vlgmr.msra.gmra.mxu3 %vm138_vm1, %v708_v29 }
0x1a1b   :  { %v729_v30 = vpop.f32.mrf.mxu3 }
0x1a1c   :  { %v730_v31 = vadd.f32 %v1482_v43, %v729_v30 }
0x1a1e   :  { %1081 = vtanh.f32 %v730_v31 }
0x1a24   :  { %v1082_v32 = vpop.eup %1081 }
0x1a25   :  { %v733_v33 = vmul.f32 %v1082_v32, %v1400_v16 }
0x1a27   :  { %v734_v34 = vadd.f32 %v733_v33, %v1402_v18 }
0x1a29   :  { %737 = vrot.lane.b32.xlu1 %v734_v34, %s1261_s17  ;;  %v735_v48 = vmul.f32 %v734_v34, %v643_v25 }
0x1a9b   :  { %v738_v35 = vpop.permute.xlu1 %737 }
0x1a9c   :  { %v740_v38 = vmul.f32 %v738_v35, %v734_v34 }
0x1a9e   :  { %742 = vrot.lane.b32.xlu2 %v740_v38, %s1260_s8 }
0x1aa6   :  { %756 = vrot.lane.b32.xlu2 %v700_v45, %s1261_s17 }
0x1af8   :  { %v743_v49 = vpop.permute.xlu2 %742 }
0x1af9   :  { %v745_v50 = vadd.f32 %v743_v49, %v735_v48 }
0x1afb   :  { %1083 = vtanh.f32 %v745_v50 }
0x1b00   :  { %v757_v54 = vpop.permute.xlu2 %756 }
0x1b01   :  { %v1084_v51 = vpop.eup %1083 }
0x1b02   :  { %748 = vrot.lane.b32.xlu0 %v1084_v51, %s1261_s17 }
0x1b74   :  { %v749_v52 = vpop.permute.xlu0 %748 }
0x1b75   :  { %v751_v53 = vmul.f32 %v749_v52, %v734_v34 }
0x1b77   :  { %753 = vrot.lane.b32.xlu1 %v751_v53, %s1260_s8 }
0x1be9   :  { %v754_v55 = vpop.permute.xlu1 %753 }
0x1bea   :  { %v759_v56 = vsel %vm136_vm0, %v754_v55, %v757_v54  ;;  %v956_v55 = vld [vmem:[%s1703_s7] sm:$0xff] }
0x1beb   :  { %1022 = vmatmul.msk.f32.vlgmr.msrb.gmra.mxu0 %vm138_vm1, %v759_v56 }
0x1c68   :  { %v780_v57 = vpop.f32.mrf.mxu0 }
0x1c69   :  { %v781_v58 = vadd.f32 %v780_v57, %v1397_v13 }
0x1c6b   :  { %1085 = vtanh.f32 %v781_v58 }
0x1c71   :  { %v1086_v59 = vpop.eup %1085 }
0x1c72   :  { %v784_v60 = vmul.f32 %v1086_v59, %v1400_v16  ;;  %v960_v59 = vld [vmem:[#allocation10] sm:$0xff] }
0x1c74   :  { %v785_v61 = vadd.f32 %v784_v60, %v1402_v18 }
0x1c76   :  { %788 = vrot.lane.b32.xlu0 %v785_v61, %s1261_s17  ;;  %v786_v0 = vmul.f32 %v785_v61, %v694_v41 }
0x1ce8   :  { %v789_v62 = vpop.permute.xlu0 %788 }
0x1ce9   :  { %v791_v63 = vmul.f32 %v789_v62, %v785_v61 }
0x1ceb   :  { %793 = vrot.lane.b32.xlu1 %v791_v63, %s1260_s8 }
0x1cf3   :  { %807 = vrot.lane.b32.xlu1 %v751_v53, %s1261_s17 }
0x1d5d   :  { %v794_v9 = vpop.permute.xlu1 %793 }
0x1d5e   :  { %v796_v10 = vadd.f32 %v794_v9, %v786_v0 }
0x1d60   :  { %1087 = vtanh.f32 %v796_v10 }
0x1d65   :  { %v808_v15 = vpop.permute.xlu1 %807 }
0x1d66   :  { %v1088_v11 = vpop.eup %1087 }
0x1d67   :  { %799 = vrot.lane.b32.xlu2 %v1088_v11, %s1261_s17 }
0x1dc1   :  { %v800_v12 = vpop.permute.xlu2 %799 }
0x1dc2   :  { %v802_v14 = vmul.f32 %v800_v12, %v785_v61 }
0x1dc4   :  { %804 = vrot.lane.b32.xlu0 %v802_v14, %s1260_s8 }
0x1e36   :  { %v805_v17 = vpop.permute.xlu0 %804 }
0x1e37   :  { %v810_v19 = vsel %vm136_vm0, %v805_v17, %v808_v15 }
0x1e38   :  { %1023 = vmatmul.msk.f32.vlgmr.msrb.gmra.mxu1 %vm138_vm1, %v810_v19 }
0x1eb5   :  { %v831_v20 = vpop.f32.mrf.mxu1 }
0x1eb6   :  { %v832_v21 = vadd.f32 %v1482_v43, %v831_v20 }
0x1eb8   :  { %1089 = vtanh.f32 %v832_v21 }
0x1ebe   :  { %v1090_v22 = vpop.eup %1089 }
0x1ebf   :  { %v835_v23 = vmul.f32 %v1090_v22, %v1400_v16 }
0x1ec1   :  { %v836_v24 = vadd.f32 %v835_v23, %v1402_v18 }
0x1ec3   :  { %839 = vrot.lane.b32.xlu2 %v836_v24, %s1261_s17  ;;  %v837_v27 = vmul.f32 %v836_v24, %v745_v50 }
0x1f1d   :  { %v840_v25 = vpop.permute.xlu2 %839 }
0x1f1e   :  { %v842_v26 = vmul.f32 %v840_v25, %v836_v24 }
0x1f20   :  { %844 = vrot.lane.b32.xlu0 %v842_v26, %s1260_s8 }
0x1f28   :  { %858 = vrot.lane.b32.xlu0 %v802_v14, %s1261_s17 }
0x1f92   :  { %v845_v28 = vpop.permute.xlu0 %844 }
0x1f93   :  { %v847_v36 = vadd.f32 %v845_v28, %v837_v27 }
0x1f95   :  { %1091 = vtanh.f32 %v847_v36 }
0x1f9a   :  { %v859_v3 = vpop.permute.xlu0 %858 }
0x1f9b   :  { %v1092_v37 = vpop.eup %1091 }
0x1f9c   :  { %850 = vrot.lane.b32.xlu1 %v1092_v37, %s1261_s17 }
0x200e   :  { %v851_v1 = vpop.permute.xlu1 %850 }
0x200f   :  { %v853_v2 = vmul.f32 %v851_v1, %v836_v24 }
0x2011   :  { %855 = vrot.lane.b32.xlu2 %v853_v2, %s1260_s8 }
0x206b   :  { %v856_v4 = vpop.permute.xlu2 %855 }
0x206c   :  { %v861_v5 = vsel %vm136_vm0, %v856_v4, %v859_v3 }
0x206d   :  { %1024 = vmatmul.msk.f32.vlgmr.msrb.gmra.mxu2 %vm138_vm1, %v861_v5 }
0x20f0   :  { %v882_v6 = vpop.f32.mrf.mxu2 }
0x20f1   :  { %v883_v7 = vadd.f32 %v882_v6, %v1397_v13 }
0x20f3   :  { %1093 = vtanh.f32 %v883_v7 }
0x20f9   :  { %v1094_v8 = vpop.eup %1093 }
0x20fa   :  { %v886_v39 = vmul.f32 %v1094_v8, %v1400_v16 }
0x20fc   :  { %v887_v40 = vadd.f32 %v886_v39, %v1402_v18 }
0x20fe   :  { %890 = vrot.lane.b32.xlu1 %v887_v40, %s1261_s17  ;;  %v888_v44 = vmul.f32 %v887_v40, %v796_v10 }
0x2170   :  { %v891_v41 = vpop.permute.xlu1 %890 }
0x2171   :  { %v893_v42 = vmul.f32 %v891_v41, %v887_v40 }
0x2173   :  { %895 = vrot.lane.b32.xlu2 %v893_v42, %s1260_s8 }
0x217b   :  { %909 = vrot.lane.b32.xlu2 %v853_v2, %s1261_s17 }
0x21cd   :  { %v896_v45 = vpop.permute.xlu2 %895 }
0x21ce   :  { %v898_v46 = vadd.f32 %v896_v45, %v888_v44 }
0x21d0   :  { %1095 = vtanh.f32 %v898_v46 }
0x21d5   :  { %v910_v30 = vpop.permute.xlu2 %909 }
0x21d6   :  { %v1096_v47 = vpop.eup %1095 }
0x21d7   :  { %901 = vrot.lane.b32.xlu0 %v1096_v47, %s1261_s17 }
0x2249   :  { %v902_v13 = vpop.permute.xlu0 %901 }
0x224a   :  { %v904_v29 = vmul.f32 %v902_v13, %v887_v40 }
0x224c   :  { %906 = vrot.lane.b32.xlu1 %v904_v29, %s1260_s8 }
0x22be   :  { %v907_v31 = vpop.permute.xlu1 %906 }
0x22bf   :  { %v912_v32 = vsel %vm136_vm0, %v907_v31, %v910_v30 }
0x22c0   :  { %1025 = vmatmul.msk.f32.vlgmr.msrb.gmra.mxu3 %vm138_vm1, %v912_v32 }
0x2343   :  { %v933_v33 = vpop.f32.mrf.mxu3 }
0x2344   :  { %v934_v34 = vadd.f32 %v1482_v43, %v933_v33  ;;  %v959_v43 = vld [vmem:[%s1703_s7 + $0x18] sm:$0xff] }
0x2345   :  { %978 = vmatpush.msra.mxu0 %v959_v43 }
0x2346   :  { %1097 = vtanh.f32 %v934_v34 }
0x234c   :  { %v1098_v35 = vpop.eup %1097 }
0x234d   :  { %v937_v38 = vmul.f32 %v1098_v35, %v1400_v16  ;;  %v958_v16 = vld [vmem:[%s1703_s7 + $0x10] sm:$0xff] }
0x234e   :  { %979 = vmatpush.msra.mxu0 %v958_v16 }
0x234f   :  { %v938_v48 = vadd.f32 %v937_v38, %v1402_v18  ;;  %v957_v18 = vld [vmem:[%s1703_s7 + $0x8] sm:$0xff] }
0x2350   :  { %980 = vmatpush.msra.mxu0 %v957_v18 }
0x2351   :  { %941 = vrot.lane.b32.xlu0 %v938_v48, %s1261_s17  ;;  %v939_v51 = vmul.f32 %v938_v48, %v847_v36 }
0x2352   :  { %981 = vmatpush.msra.mxu0 %v956_v55 }
0x23c3   :  { %v942_v49 = vpop.permute.xlu0 %941 }
0x23c4   :  { %v944_v50 = vmul.f32 %v942_v49, %v938_v48 }
0x23c6   :  { %946 = vrot.lane.b32.xlu1 %v944_v50, %s1260_s8 }
0x2438   :  { %v947_v52 = vpop.permute.xlu1 %946 }
0x2439   :  { %v949_v53 = vadd.f32 %v947_v52, %v939_v51 }
0x243b   :  { %1099 = vtanh.f32 %v949_v53 }
0x2441   :  { %v1100_v54 = vpop.eup %1099 }
0x2442   :  { %952 = vrot.lane.b32.xlu2 %v1100_v54, %s1261_s17 }
0x249c   :  { %v953_v56 = vpop.permute.xlu2 %952 }
0x249d   :  { %v955_v57 = vmul.f32 %v953_v56, %v938_v48 }
0x249f   :  { %962 = vrot.lane.b32.xlu0 %v955_v57, %s1260_s8 }
0x2511   :  { %v963_v58 = vpop.permute.xlu0 %962 }
0x2512   :  { %1026 = vmatmul.msk.f32.vlgmr.msra.gmra.mxu0 %vm136_vm0, %v963_v58 }
0x258f   :  { %v983_v60 = vpop.f32.mrf.mxu0 }
0x2590   :  { %v984_v61 = vadd.f32 %v983_v60, %v960_v59 }
0x2592   :  { %987 = vst.msk [vmem:[#allocation11] sm:$0xff] %vm986_vm2, %v984_v61 }
0x2593   :  { %998 = dma.vmem_to_hbm [thread:$0]  %s994_s28, 128, %s996_s10, [#allocation4]  }
0x2594   :  { %1251 = dma.done.wait [#allocation4], 128  }
0x2595   :  { %1252 = vsyncadd [#allocation4], 4294967168 }
0x2596   :  { %1003 = vsyncpa [#allocation3], 1 }
0x2597   :  { %1004 = vsyncpa [#allocation6], 1 }
0x2598   :  { %1005 = vsyncpa [#allocation9], 1 }
0x2599   :  { %1006 = vsyncpa [#allocation4], 1 }

</bundles_post_ra>
